<compile_context>
chip_gen: v5e
topology: v5e:2x2
jax: 0.10.0
libtpu: 0.0.40
codegen_flags: <defaults>
</compile_context>

<pallas_src>
import functools
import math

import jax
import jax.numpy as jnp
import numpy as np
from jax.experimental import pallas as pl
from jax.experimental.pallas import tpu as pltpu

LANE = 128              # lane-dim alignment
SUBLANE_BF16 = 16       # bf16 sublane packing (second-to-last dim alignment)
TM_CAP = 512            # cap M tile (keeps v7x's 64 MiB VMEM in budget)
VMEM_FLOOR = 16 * 1024 * 1024
VMEM_CEIL = 56 * 1024 * 1024   # stay below v7x's 64 MiB physical VMEM


def _round_up(a, b):
    return (a + b - 1) // b * b


def _cdiv(a, b):
    return (a + b - 1) // b


@functools.lru_cache(maxsize=1)
def _num_tensorcores():
    """v7x exposes 2 TensorCores per chip; v5e/v6e have 1 (single-core chips
    get one M block so the small stride-2 GEMMs don't pay an extra grid step
    or 98->128 row padding)."""
    try:
        info = pltpu.get_tpu_info()
        for attr in ("num_tensorcores", "tensorcore_count", "num_cores",
                     "cores_per_chip", "num_cores_per_chip"):
            v = getattr(info, attr, None)
            if isinstance(v, int) and 1 <= v <= 8:
                return v
    except Exception:
        pass
    try:
        kind = (getattr(jax.devices()[0], "device_kind", "") or "").lower()
        if "v7" in kind:
            return 2
    except Exception:
        pass
    return 1


# ----------------------------------------------------------------------------
# Pallas kernels: fused GEMM + bias, column-split outputs
# ----------------------------------------------------------------------------
def _gemm_bias_fused_kernel(x_ref, w_ref, b_ref, *o_refs):
    """Whole-K pass: o = x @ w + b, stored (and cast) per output column group.
    No scratch, no predicate — used when K is not split."""
    acc = jnp.dot(x_ref[...], w_ref[...], preferred_element_type=jnp.float32)
    acc = acc + b_ref[...]
    col = 0
    for o_ref in o_refs:
        w_o = o_ref.shape[-1]
        o_ref[...] = acc[:, col:col + w_o].astype(o_ref.dtype)
        col += w_o


def _gemm_bias_ksplit_kernel(x_ref, w_ref, b_ref, *rest):
    """K-split GEMM: f32 VMEM scratch accumulates across the innermost
    'arbitrary' k axis; bias folded into the k==0 init; outputs stored (and
    cast to their dtype) on the last k step.  Output index_map is k-invariant."""
    *o_refs, acc_ref = rest
    k = pl.program_id(1)

    @pl.when(k == 0)
    def _():
        acc_ref[...] = jnp.zeros_like(acc_ref) + b_ref[...]

    acc_ref[...] += jnp.dot(x_ref[...], w_ref[...],
                            preferred_element_type=jnp.float32)

    @pl.when(k == pl.num_programs(1) - 1)
    def _():
        acc = acc_ref[...]
        col = 0
        for o_ref in o_refs:
            w_o = o_ref.shape[-1]
            o_ref[...] = acc[:, col:col + w_o].astype(o_ref.dtype)
            col += w_o


# ----------------------------------------------------------------------------
# Weight prep (one-time, outside the forward)
# ----------------------------------------------------------------------------
def _choose_k_splits(K):
    # Review: 2-4 way K split for the K=2304 conv GEMMs so later weight/x DMA
    # overlaps the first chunk's MXU pass; small K stays unsplit.
    return 2 if K >= 2048 else 1


def prep_gemm(ws_and_bs):
    """Pack one or more (w, b) conv params (same KH, KW, Cin) into a single
    GEMM-ready record: bf16 weight reshaped to (Kp, sum(padded Cout)) and
    padded ONCE; f32 bias padded.  Eliminates per-forward weight cast/pad."""
    KH, KW, Cin, _ = ws_and_bs[0][0].shape
    K = KH * KW * Cin
    ks = _choose_k_splits(K)
    # keep the per-chunk K tile lane-aligned when split; sublane-only pad else
    Kp = _round_up(K, (LANE * ks) if ks > 1 else SUBLANE_BF16)

    w_cols, b_cols, widths, pwidths = [], [], [], []
    for w, b in ws_and_bs:
        assert w.shape[:3] == (KH, KW, Cin)
        Cout = w.shape[3]
        Np = _round_up(Cout, LANE)
        wm = w.reshape(K, Cout).astype(jnp.bfloat16)
        wm = jnp.pad(wm, ((0, Kp - K), (0, Np - Cout)))
        bm = jnp.pad(b.astype(jnp.float32), (0, Np - Cout))
        w_cols.append(wm)
        b_cols.append(bm)
        widths.append(Cout)
        pwidths.append(Np)

    return dict(
        w=jnp.concatenate(w_cols, axis=1),
        b=jnp.concatenate(b_cols).reshape(1, -1),
        K=K, Kp=Kp, k_splits=ks, KH=KH, KW=KW, Cin=Cin,
        widths=tuple(widths), pwidths=tuple(pwidths))


# ----------------------------------------------------------------------------
# GEMM wrapper
# ----------------------------------------------------------------------------
def gemm_bias(x, prep, out_dtypes):
    """x: (M, K) activations (bf16).  prep: record from prep_gemm (weights are
    already bf16 / padded).  Returns a tuple of (M, width) arrays, one per
    output column group, each in its requested dtype."""
    M, K = x.shape
    assert K == prep["K"], (K, prep["K"])
    Kp, ks = prep["Kp"], prep["k_splits"]
    widths, pwidths = prep["widths"], prep["pwidths"]
    assert len(out_dtypes) == len(widths)
    tnp = sum(pwidths)
    tk = Kp // ks

    # Chip-aware M tiling: split M only where a second TensorCore exists, and
    # cap the tile so large-M cases keep deep pipelining & fit v7x VMEM.
    ncores = _num_tensorcores()
    tm_full = _round_up(max(M, 1), SUBLANE_BF16)
    if ncores > 1 and M >= 2 * SUBLANE_BF16:
        tm = _round_up(_cdiv(M, ncores), SUBLANE_BF16)
    else:
        tm = tm_full
    tm = min(tm, TM_CAP, tm_full)
    num_m = _cdiv(M, tm)
    mp = num_m * tm

    xp = x.astype(jnp.bfloat16)
    if (mp, Kp) != (M, K):
        xp = jnp.pad(xp, ((0, mp - M), (0, Kp - K)))

    out_shapes = tuple(jax.ShapeDtypeStruct((mp, pw), dt)
                       for pw, dt in zip(pwidths, out_dtypes))

    # vmem limit from the actual (double-buffered) tile footprint
    out_bytes = sum(tm * pw * np.dtype(dt).itemsize
                    for pw, dt in zip(pwidths, out_dtypes))
    footprint = (2 * (tm * tk * 2) + 2 * (tk * tnp * 2) + 2 * (tnp * 4)
                 + 2 * out_bytes + (tm * tnp * 4 if ks > 1 else 0))
    vmem_limit = int(min(max(footprint + (4 << 20), VMEM_FLOOR), VMEM_CEIL))

    if ks == 1:
        grid = (num_m,)
        in_specs = [
            pl.BlockSpec((tm, tk), lambda i: (i, 0)),
            pl.BlockSpec((tk, tnp), lambda i: (0, 0)),
            pl.BlockSpec((1, tnp), lambda i: (0, 0)),
        ]
        out_specs = [pl.BlockSpec((tm, pw), lambda i: (i, 0)) for pw in pwidths]
        outs = pl.pallas_call(
            _gemm_bias_fused_kernel,
            out_shape=out_shapes,
            grid_spec=pltpu.PrefetchScalarGridSpec(
                num_scalar_prefetch=0, grid=grid,
                in_specs=in_specs, out_specs=out_specs),
            compiler_params=pltpu.CompilerParams(
                dimension_semantics=("parallel",),
                vmem_limit_bytes=vmem_limit),
        )(xp, prep["w"], prep["b"])
    else:
        grid = (num_m, ks)          # k innermost, 'arbitrary'
        in_specs = [
            pl.BlockSpec((tm, tk), lambda i, k: (i, k)),
            pl.BlockSpec((tk, tnp), lambda i, k: (k, 0)),
            pl.BlockSpec((1, tnp), lambda i, k: (0, 0)),
        ]
        out_specs = [pl.BlockSpec((tm, pw), lambda i, k: (i, 0))
                     for pw in pwidths]
        outs = pl.pallas_call(
            _gemm_bias_ksplit_kernel,
            out_shape=out_shapes,
            grid_spec=pltpu.PrefetchScalarGridSpec(
                num_scalar_prefetch=0, grid=grid,
                in_specs=in_specs, out_specs=out_specs,
                scratch_shapes=[pltpu.VMEM((tm, tnp), jnp.float32)]),
            compiler_params=pltpu.CompilerParams(
                dimension_semantics=("parallel", "arbitrary"),
                vmem_limit_bytes=vmem_limit),
        )(xp, prep["w"], prep["b"])

    if not isinstance(outs, (tuple, list)):
        outs = (outs,)
    return tuple(o[:M, :wd] for o, wd in zip(outs, widths))


# ----------------------------------------------------------------------------
# Conv via (bf16) im2col + Pallas GEMM
# ----------------------------------------------------------------------------
def extract_patches(x, kh, kw, stride, padding):
    """im2col glue (plain JAX, bf16 in -> bf16 patches).
    x: (N, H, W, C) -> ((N*Ho*Wo, kh*kw*C), (N, Ho, Wo))."""
    N, H, W, C = x.shape
    if padding:
        x = jnp.pad(x, ((0, 0), (padding, padding), (padding, padding), (0, 0)))
    Hp, Wp = x.shape[1], x.shape[2]
    Ho = (Hp - kh) // stride + 1
    Wo = (Wp - kw) // stride + 1
    cols = []
    for i in range(kh):
        for j in range(kw):
            sl = jax.lax.slice(
                x, (0, i, j, 0),
                (N, i + stride * (Ho - 1) + 1, j + stride * (Wo - 1) + 1, C),
                (1, stride, stride, 1))
            cols.append(sl)                              # (N, Ho, Wo, C)
    patches = jnp.stack(cols, axis=3)                    # (N, Ho, Wo, kh*kw, C)
    return patches.reshape(N * Ho * Wo, kh * kw * C), (N, Ho, Wo)


def conv2d(x, prep, stride=1, padding=0, out_dtype=jnp.float32):
    """NHWC conv via the Pallas GEMM.  x bf16; prep is a single-output
    prep_gemm record."""
    KH, KW = prep["KH"], prep["KW"]
    N, H, W, C = x.shape
    assert C == prep["Cin"]
    if KH == 1 and KW == 1 and stride == 1 and padding == 0:
        xf = x.reshape(N * H * W, C)
        Ho, Wo = H, W
    else:
        xf, (N, Ho, Wo) = extract_patches(x, KH, KW, stride, padding)
    (out,) = gemm_bias(xf, prep, (out_dtype,))
    return out.reshape(N, Ho, Wo, -1)


def maxpool3x3s2(x):
    """MaxPool2d(kernel=3, stride=2).  C=4 is lane-starved (4/128 lanes) as a
    Pallas kernel, so per the perf review it stays in XLA."""
    return jax.lax.reduce_window(x, -jnp.inf, jax.lax.max,
                                 (1, 3, 3, 1), (1, 2, 2, 1), "VALID")


# ----------------------------------------------------------------------------
# ReducationB forward (Pallas hot path)
# ----------------------------------------------------------------------------
def prepare_params(p):
    """One-time prep: bf16 GEMM-layout weights; the three 1x1 branch-stem
    convs fused into a single K=Cin, N=768 GEMM with three column groups."""
    return {
        "stem": prep_gemm([p["b1_0"], p["b2_0"], p["b3_0"]]),
        "b1_1": prep_gemm([p["b1_1"]]),
        "b1_2": prep_gemm([p["b1_2"]]),
        "b2_1": prep_gemm([p["b2_1"]]),
        "b3_1": prep_gemm([p["b3_1"]]),
    }


def reducation_b_forward(x_nchw, pp):
    x_f32 = jnp.transpose(x_nchw, (0, 2, 3, 1))           # NCHW -> NHWC
    N, H, W, Cin = x_f32.shape
    x = x_f32.astype(jnp.bfloat16)                        # cast input once

    # Fused 3-way 1x1 stem: one GEMM, three bf16 slab outputs (no XLA slices).
    s1, s2, s3 = gemm_bias(x.reshape(N * H * W, Cin), pp["stem"],
                           (jnp.bfloat16, jnp.bfloat16, jnp.bfloat16))
    s1 = s1.reshape(N, H, W, -1)
    s2 = s2.reshape(N, H, W, -1)
    s3 = s3.reshape(N, H, W, -1)

    # branch 1: (1x1) -> 3x3 s1 (bf16 intermediate) -> 3x3 s2 p1 (f32 out)
    b1 = conv2d(s1, pp["b1_1"], stride=1, padding=0, out_dtype=jnp.bfloat16)
    b1 = conv2d(b1, pp["b1_2"], stride=2, padding=1, out_dtype=jnp.float32)
    # branch 2: (1x1) -> 3x3 s2
    b2 = conv2d(s2, pp["b2_1"], stride=2, padding=0, out_dtype=jnp.float32)
    # branch 3: (1x1) -> 3x3 s2 (384 out)
    b3 = conv2d(s3, pp["b3_1"], stride=2, padding=0, out_dtype=jnp.float32)
    # branch 4: maxpool 3x3 s2 (exact, f32)
    b4 = maxpool3x3s2(x_f32)

    out = jnp.concatenate([b1, b2, b3, b4], axis=-1)      # channel concat
    return jnp.transpose(out, (0, 3, 1, 2))               # NHWC -> NCHW


# ----------------------------------------------------------------------------
# Reference (XLA convs with the SAME precision policy: bf16 operands / f32
# accumulation / bf16 intermediate activations) — apples-to-apples check.
# ----------------------------------------------------------------------------
def reference_forward(x_nchw, p):
    x = jnp.transpose(x_nchw, (0, 2, 3, 1))

    def c(h, wb, s, pad, out_dtype=jnp.float32):
        w, b = wb
        y = jax.lax.conv_general_dilated(
            h.astype(jnp.bfloat16), w.astype(jnp.bfloat16), (s, s),
            [(pad, pad), (pad, pad)],
            dimension_numbers=("NHWC", "HWIO", "NHWC"),
            preferred_element_type=jnp.float32)
        return (y + b).astype(out_dtype)

    b1 = c(x, p["b1_0"], 1, 0, jnp.bfloat16)
    b1 = c(b1, p["b1_1"], 1, 0, jnp.bfloat16)
    b1 = c(b1, p["b1_2"], 2, 1)
    b2 = c(c(x, p["b2_0"], 1, 0, jnp.bfloat16), p["b2_1"], 2, 0)
    b3 = c(c(x, p["b3_0"], 1, 0, jnp.bfloat16), p["b3_1"], 2, 0)
    b4 = jax.lax.reduce_window(x, -jnp.inf, jax.lax.max,
                               (1, 3, 3, 1), (1, 2, 2, 1), "VALID")
    out = jnp.concatenate([b1, b2, b3, b4], axis=-1)
    return jnp.transpose(out, (0, 3, 1, 2))


# ----------------------------------------------------------------------------
# Deterministic parameter init (PyTorch-Conv2d-style uniform bounds)
# ----------------------------------------------------------------------------
def init_conv(key, kh, kw, cin, cout):
    k1, k2 = jax.random.split(key)
    bound = 1.0 / math.sqrt(kh * kw * cin)
    w = jax.random.uniform(k1, (kh, kw, cin, cout), jnp.float32, -bound, bound)
    b = jax.random.uniform(k2, (cout,), jnp.float32, -bound, bound)
    return w, b


def init_params(key, in_channels):
    ks = jax.random.split(key, 7)
    return {
        "b1_0": init_conv(ks[0], 1, 1, in_channels, 256),
        "b1_1": init_conv(ks[1], 3, 3, 256, 256),
        "b1_2": init_conv(ks[2], 3, 3, 256, 256),
        "b2_0": init_conv(ks[3], 1, 1, in_channels, 256),
        "b2_1": init_conv(ks[4], 3, 3, 256, 256),
        "b3_0": init_conv(ks[5], 1, 1, in_channels, 256),
        "b3_1": init_conv(ks[6], 3, 3, 256, 384),
    }


if __name__ == "__main__":
    key = jax.random.PRNGKey(0)
    k_x, k_p = jax.random.split(key)

    N, Cin, H, W = 2, 4, 16, 16
    x = jax.random.normal(k_x, (N, Cin, H, W), jnp.float32)
    params = init_params(k_p, Cin)
    pp = prepare_params(params)        # one-time bf16 weight prep (perf review)

    out = reducation_b_forward(x, pp)
    out = jax.block_until_ready(out)

    Ho = (H - 3) // 2 + 1
    assert out.shape == (N, 256 + 256 + 384 + Cin, Ho, Ho), out.shape

    ref = jax.block_until_ready(reference_forward(x, params))
    np.testing.assert_allclose(np.asarray(out), np.asarray(ref),
                               rtol=1e-2, atol=1e-2)

    print("KERNEL_OK")
</pallas_src>

<mosaic_0001>
module attributes {stable_mosaic.version = 11 : i64} {
  func.func @_gemm_bias_fused_kernel(%arg0: i32, %arg1: memref<512x16xbf16, #tpu.memory_space<vmem>>, %arg2: memref<16x768xbf16, #tpu.memory_space<vmem>>, %arg3: memref<1x768xf32, #tpu.memory_space<vmem>>, %arg4: memref<512x256xbf16, #tpu.memory_space<vmem>>, %arg5: memref<512x256xbf16, #tpu.memory_space<vmem>>, %arg6: memref<512x256xbf16, #tpu.memory_space<vmem>>) attributes {dimension_semantics = [#tpu.dimension_semantics<parallel>], iteration_bounds = array<i64: 1>, scalar_prefetch = 0 : i64, scratch_operands = 0 : i64, tpu.core_type = #tpu.core_type<tc>, window_params = [{transform_indices = @transform_0, window_bounds = array<i64: 512, 16>}, {pipeline_mode = #tpu.pipeline_mode<synchronous>, transform_indices = @transform_1, window_bounds = array<i64: 16, 768>}, {pipeline_mode = #tpu.pipeline_mode<synchronous>, transform_indices = @transform_2, window_bounds = array<i64: 1, 768>}, {transform_indices = @transform_3, window_bounds = array<i64: 512, 256>}, {transform_indices = @transform_4, window_bounds = array<i64: 512, 256>}, {transform_indices = @transform_5, window_bounds = array<i64: 512, 256>}]} {
    %c0 = arith.constant 0 : index
    %c0_0 = arith.constant 0 : index
    %0 = vector.load %arg1[%c0, %c0_0] : memref<512x16xbf16, #tpu.memory_space<vmem>>, vector<512x16xbf16>
    %c0_1 = arith.constant 0 : index
    %c0_2 = arith.constant 0 : index
    %1 = vector.load %arg2[%c0_1, %c0_2] : memref<16x768xbf16, #tpu.memory_space<vmem>>, vector<16x768xbf16>
    %cst = arith.constant dense<0.000000e+00> : vector<512x768xf32>
    %2 = tpu.matmul %0, %1, %cst {dimension_numbers = #tpu.dot_dimension_numbers<[1], [0], [0], [1], [0, 0, 1, 1], [], []>} : vector<512x16xbf16>, vector<16x768xbf16>, vector<512x768xf32> -> vector<512x768xf32>
    %c0_3 = arith.constant 0 : index
    %c0_4 = arith.constant 0 : index
    %3 = vector.load %arg3[%c0_3, %c0_4] : memref<1x768xf32, #tpu.memory_space<vmem>>, vector<1x768xf32>
    %4 = vector.broadcast %3 : vector<1x768xf32> to vector<512x768xf32>
    %5 = arith.addf %2, %4 : vector<512x768xf32>
    %6 = vector.extract_strided_slice %5 {offsets = [0, 0], sizes = [512, 256], strides = [1, 1]} : vector<512x768xf32> to vector<512x256xf32>
    %7 = arith.truncf %6 : vector<512x256xf32> to vector<512x256xbf16>
    %c0_5 = arith.constant 0 : index
    %c0_6 = arith.constant 0 : index
    %8 = vector.load %arg4[%c0_5, %c0_6] : memref<512x256xbf16, #tpu.memory_space<vmem>>, vector<512x256xbf16>
    tpu.vector_store %arg4[%c0_5, %c0_6], %7 {strides = array<i32>} : memref<512x256xbf16, #tpu.memory_space<vmem>>, vector<512x256xbf16>,
    %9 = vector.extract_strided_slice %5 {offsets = [0, 256], sizes = [512, 256], strides = [1, 1]} : vector<512x768xf32> to vector<512x256xf32>
    %10 = arith.truncf %9 : vector<512x256xf32> to vector<512x256xbf16>
    %c0_7 = arith.constant 0 : index
    %c0_8 = arith.constant 0 : index
    %11 = vector.load %arg5[%c0_7, %c0_8] : memref<512x256xbf16, #tpu.memory_space<vmem>>, vector<512x256xbf16>
    tpu.vector_store %arg5[%c0_7, %c0_8], %10 {strides = array<i32>} : memref<512x256xbf16, #tpu.memory_space<vmem>>, vector<512x256xbf16>,
    %12 = vector.extract_strided_slice %5 {offsets = [0, 512], sizes = [512, 256], strides = [1, 1]} : vector<512x768xf32> to vector<512x256xf32>
    %13 = arith.truncf %12 : vector<512x256xf32> to vector<512x256xbf16>
    %c0_9 = arith.constant 0 : index
    %c0_10 = arith.constant 0 : index
    %14 = vector.load %arg6[%c0_9, %c0_10] : memref<512x256xbf16, #tpu.memory_space<vmem>>, vector<512x256xbf16>
    tpu.vector_store %arg6[%c0_9, %c0_10], %13 {strides = array<i32>} : memref<512x256xbf16, #tpu.memory_space<vmem>>, vector<512x256xbf16>,
    return
  }
  func.func @transform_0(%arg0: i32) -> (i32, i32) {
    %c0_i32 = arith.constant 0 : i32
    %c0_i32_0 = arith.constant 0 : i32
    return %arg0, %c0_i32 : i32, i32
  }
  func.func @transform_1(%arg0: i32) -> (i32, i32) {
    %c0_i32 = arith.constant 0 : i32
    %c0_i32_0 = arith.constant 0 : i32
    %c0_i32_1 = arith.constant 0 : i32
    return %c0_i32, %c0_i32_0 : i32, i32
  }
  func.func @transform_2(%arg0: i32) -> (i32, i32) {
    %c0_i32 = arith.constant 0 : i32
    %c0_i32_0 = arith.constant 0 : i32
    %c0_i32_1 = arith.constant 0 : i32
    return %c0_i32, %c0_i32_0 : i32, i32
  }
  func.func @transform_3(%arg0: i32) -> (i32, i32) {
    %c0_i32 = arith.constant 0 : i32
    %c0_i32_0 = arith.constant 0 : i32
    return %arg0, %c0_i32 : i32, i32
  }
  func.func @transform_4(%arg0: i32) -> (i32, i32) {
    %c0_i32 = arith.constant 0 : i32
    %c0_i32_0 = arith.constant 0 : i32
    return %arg0, %c0_i32 : i32, i32
  }
  func.func @transform_5(%arg0: i32) -> (i32, i32) {
    %c0_i32 = arith.constant 0 : i32
    %c0_i32_0 = arith.constant 0 : i32
    return %arg0, %c0_i32 : i32, i32
  }
}

</mosaic_0001>

<bundles_post_ra>
// kernel: tpu_custom_call.1
= control target key start
LH: loop header
LB: loop body
LE: loop exit
PB: predicated region body
PF: predicated region fallthrough
CT: control target
= control target key end

     0   :  { %11 = vsyncpa [#allocation3], 0  ;;  %vm294_vm0 = vcmask 130048   ;;  %s3283_s0 = inlined_call_operand.vmem [shape: bf16[512,16], index: 0, kind: input, shape index: {}]   ;;  %s3284_s1 = inlined_call_operand.vmem [shape: bf16[16,768], index: 1, kind: input, shape index: {}]   ;;  %s3285_s2 = inlined_call_operand.vmem [shape: f32[1,768], index: 2, kind: input, shape index: {}]   ;;  %s3286_s3 = inlined_call_operand.hbm [shape: bf16[512,256], index: 3, kind: output, shape index: {0}]   ;;  %s3287_s4 = inlined_call_operand.hbm [shape: bf16[512,256], index: 4, kind: output, shape index: {1}]   ;;  %s3288_s5 = inlined_call_operand.hbm [shape: bf16[512,256], index: 5, kind: output, shape index: {2}]  }
   0x1   :  { %v1972_v0 = vld [vmem:[%s3284_s1] sm:$0xf]  ;;  %v2221_v1 = vld [vmem:[%s3284_s1 + $0x14] sm:$0xf0]  ;;  %v2218_v2 = vld [vmem:[%s3284_s1 + $0x4] sm:$0xf] }
   0x2   :  { %v1973_v3 = vor.u32 %v2221_v1, %v1972_v0  ;;  %v1974_v4 = vld [vmem:[%s3284_s1 + $0x18] sm:$0xf0]  ;;  %v2373_v5 = vld [vmem:[%s3283_s0] sm:$0xff]  ;;  %v1980_v8 = vld [vmem:[%s3284_s1 + $0x8] sm:$0xf] }
   0x3   :  { %v2202_v6 = vld [vmem:[%s3283_s0 + $0x80] sm:$0xff]  ;;  %v1977_v7 = vor.u32 %v2218_v2, %v1974_v4  ;;  %v2219_v10 = vld [vmem:[%s3284_s1 + $0xc] sm:$0xf]  ;;  %v1988_v13 = vld [vmem:[%s3284_s1 + $0x10] sm:$0xf] }
   0x4   :  { %v2222_v9 = vld [vmem:[%s3284_s1 + $0x1c] sm:$0xf0]  ;;  %398 = vmatpush.bf16.msra.mxu0 %v1973_v3  ;;  %2224 = vmatpush.bf16.msra.mxu2 %v1973_v3  ;;  %v1982_v12 = vld [vmem:[%s3284_s1 + $0x20] sm:$0xf0]  ;;  %v2223_v14 = vld [vmem:[%s3284_s1 + $0x24] sm:$0xf0] }
   0x5   :  { %v1981_v11 = vor.u32 %v2222_v9, %v1980_v8  ;;  %567 = vmatpush.bf16.msra.mxu1 %v1977_v7  ;;  %2225 = vmatpush.bf16.msra.mxu3 %v1977_v7  ;;  %v1985_v15 = vor.u32 %v2219_v10, %v1982_v12  ;;  %v1989_v16 = vor.u32 %v2223_v14, %v1988_v13  ;;  %v2220_v17 = vld [vmem:[%s3284_s1 + $0x14] sm:$0xf]  ;;  %v1990_v18 = vld [vmem:[%s3284_s1 + $0x28] sm:$0xf0] }
   0x6   :  { %v1993_v19 = vor.u32 %v2220_v17, %v1990_v18 }
   0x7   :  { %1994 = vmatmul.msk.bf16.vlgmr.msra.gmra.mxu0 %vm294_vm0, %v2373_v5  ;;  %2010 = vmatmul.msk.bf16.vlgmr.msra.gmra.mxu2 %vm294_vm0, %v2202_v6 }
   0x8   :  { %736 = vmatpush.bf16.msrb.mxu2 %v1981_v11 }
   0x9   :  { %12 = vsyncpa [#allocation5], 0  ;;  %2026 = vmatmul.msk.bf16.vlgmr.msra.gmra.mxu1 %vm294_vm0, %v2373_v5  ;;  %2042 = vmatmul.msk.bf16.vlgmr.msra.gmra.mxu3 %vm294_vm0, %v2202_v6  ;;  %v2411_v20 = vld [vmem:[%s3283_s0 + $0x8] sm:$0xff]  ;;  %v2425_v22 = vld [vmem:[%s3283_s0 + $0x10] sm:$0xff]  ;;  %s1795_s9 = sshll.u32 %s3286_s3, 4  ;;  %s2323_s10 = smov [#allocation2]   ;;  %s1796_s9 = int_to_ptr.hbm [resolvable:$true] %s1795_s9 }
   0xa   :  { %905 = vmatpush.bf16.msrb.mxu3 %v1985_v15  ;;  %1074 = vmatpush.bf16.msrb.mxu0 %v1989_v16  ;;  %v2203_v21 = vld [vmem:[%s3283_s0 + $0x88] sm:$0xff]  ;;  %v2204_v23 = vld [vmem:[%s3283_s0 + $0x90] sm:$0xff]  ;;  %v2439_v24 = vld [vmem:[%s3283_s0 + $0x18] sm:$0xff]  ;;  %s1793_s11 = sshll.u32 %s2323_s10, 4  ;;  %s2324_s12 = smov 128   ;;  %s1794_s11 = int_to_ptr.vmem [resolvable:$true] %s1793_s11 }
   0xb   :  { %1243 = vmatpush.bf16.msrb.mxu1 %v1993_v19  ;;  %v2205_v25 = vld [vmem:[%s3283_s0 + $0x98] sm:$0xff]  ;;  %v2453_v26 = vld [vmem:[%s3283_s0 + $0x20] sm:$0xff]  ;;  %v2467_v28 = vld [vmem:[%s3283_s0 + $0x28] sm:$0xff]  ;;  %s2325_s13 = smov 8   ;;  %s2326_s3 = smov [#allocation4]  }
   0xc   :  { %v2206_v27 = vld [vmem:[%s3283_s0 + $0xa0] sm:$0xff]  ;;  %v2207_v29 = vld [vmem:[%s3283_s0 + $0xa8] sm:$0xff]  ;;  %v2481_v30 = vld [vmem:[%s3283_s0 + $0x30] sm:$0xff]  ;;  %s1806_s14 = sshll.u32 %s2326_s3, 4  ;;  %s1808_s17 = sshll.u32 %s3287_s4, 4  ;;  %s1807_s14 = int_to_ptr.vmem [resolvable:$true] %s1806_s14  ;;  %s1809_s17 = int_to_ptr.hbm [resolvable:$true] %s1808_s17 }
   0xd   :  { %v2208_v31 = vld [vmem:[%s3283_s0 + $0xb0] sm:$0xff]  ;;  %v2495_v32 = vld [vmem:[%s3283_s0 + $0x38] sm:$0xff]  ;;  %v2509_v34 = vld [vmem:[%s3285_s2] sm:$0x3f]  ;;  %s2327_s18 = smov [#allocation6]   ;;  %s1821_s22 = sshll.u32 %s3288_s5, 4  ;;  %s1822_s22 = int_to_ptr.hbm [resolvable:$true] %s1821_s22 }
   0xe   :  { %v2209_v33 = vld [vmem:[%s3283_s0 + $0xb8] sm:$0xff]  ;;  %v2512_v35 = vperm.slane %v2509_v34, 0  ;;  %v2515_v36 = vperm.slane %v2509_v34, 1  ;;  %v2520_v37 = vld [vmem:[%s3283_s0 + $0x40] sm:$0xff]  ;;  %v2541_v57 = vld [vmem:[%s3283_s0 + $0x48] sm:$0xff]  ;;  %s1819_s19 = sshll.u32 %s2327_s18, 4  ;;  %s1820_s19 = int_to_ptr.vmem [resolvable:$true] %s1819_s19 }
   0xf   :  { %v2210_v38 = vld [vmem:[%s3283_s0 + $0xc0] sm:$0xff]  ;;  %v2211_v58 = vld [vmem:[%s3283_s0 + $0xc8] sm:$0xff]  ;;  %v2563_v16 = vld [vmem:[%s3283_s0 + $0x50] sm:$0xff] }
  0x10   :  { %v2212_v17 = vld [vmem:[%s3283_s0 + $0xd0] sm:$0xff] }
  0x17   :  { %1995 = vmatmul.msk.bf16.gmra.mxu0 %vm294_vm0, %v2411_v20  ;;  %2011 = vmatmul.msk.bf16.gmra.mxu2 %vm294_vm0, %v2203_v21 }
  0x19   :  { %2027 = vmatmul.msk.bf16.gmra.mxu1 %vm294_vm0, %v2411_v20  ;;  %2043 = vmatmul.msk.bf16.gmra.mxu3 %vm294_vm0, %v2203_v21 }
  0x27   :  { %1996 = vmatmul.msk.bf16.gmra.mxu0 %vm294_vm0, %v2425_v22  ;;  %2012 = vmatmul.msk.bf16.gmra.mxu2 %vm294_vm0, %v2204_v23 }
  0x29   :  { %2028 = vmatmul.msk.bf16.gmra.mxu1 %vm294_vm0, %v2425_v22  ;;  %2044 = vmatmul.msk.bf16.gmra.mxu3 %vm294_vm0, %v2204_v23 }
  0x37   :  { %1997 = vmatmul.msk.bf16.gmra.mxu0 %vm294_vm0, %v2439_v24  ;;  %2013 = vmatmul.msk.bf16.gmra.mxu2 %vm294_vm0, %v2205_v25 }
  0x39   :  { %2029 = vmatmul.msk.bf16.gmra.mxu1 %vm294_vm0, %v2439_v24  ;;  %2045 = vmatmul.msk.bf16.gmra.mxu3 %vm294_vm0, %v2205_v25 }
  0x47   :  { %1998 = vmatmul.msk.bf16.gmra.mxu0 %vm294_vm0, %v2453_v26  ;;  %2014 = vmatmul.msk.bf16.gmra.mxu2 %vm294_vm0, %v2206_v27 }
  0x49   :  { %2030 = vmatmul.msk.bf16.gmra.mxu1 %vm294_vm0, %v2453_v26  ;;  %2046 = vmatmul.msk.bf16.gmra.mxu3 %vm294_vm0, %v2206_v27 }
  0x57   :  { %1999 = vmatmul.msk.bf16.gmra.mxu0 %vm294_vm0, %v2467_v28  ;;  %2015 = vmatmul.msk.bf16.gmra.mxu2 %vm294_vm0, %v2207_v29 }
  0x59   :  { %2031 = vmatmul.msk.bf16.gmra.mxu1 %vm294_vm0, %v2467_v28  ;;  %2047 = vmatmul.msk.bf16.gmra.mxu3 %vm294_vm0, %v2207_v29 }
  0x67   :  { %2000 = vmatmul.msk.bf16.gmra.mxu0 %vm294_vm0, %v2481_v30  ;;  %2016 = vmatmul.msk.bf16.gmra.mxu2 %vm294_vm0, %v2208_v31 }
  0x69   :  { %2032 = vmatmul.msk.bf16.gmra.mxu1 %vm294_vm0, %v2481_v30  ;;  %2048 = vmatmul.msk.bf16.gmra.mxu3 %vm294_vm0, %v2208_v31 }
  0x77   :  { %2001 = vmatmul.msk.bf16.gmra.mxu0 %vm294_vm0, %v2495_v32  ;;  %2017 = vmatmul.msk.bf16.gmra.mxu2 %vm294_vm0, %v2209_v33 }
  0x79   :  { %2033 = vmatmul.msk.bf16.gmra.mxu1 %vm294_vm0, %v2495_v32  ;;  %2049 = vmatmul.msk.bf16.gmra.mxu3 %vm294_vm0, %v2209_v33 }
  0x84   :  { %v400_v39 = vpop.f32.mrf.mxu0 }
  0x85   :  { %v401_v40 = vadd.f32 %v400_v39, %v2512_v35 }
  0x86   :  { %v569_v41 = vpop.f32.mrf.mxu1 }
  0x87   :  { %v570_v42 = vadd.f32 %v569_v41, %v2515_v36  ;;  %2002 = vmatmul.msk.bf16.gmra.mxu0 %vm294_vm0, %v2520_v37  ;;  %2018 = vmatmul.msk.bf16.gmra.mxu2 %vm294_vm0, %v2210_v38 }
  0x89   :  { %v1405_v43 = vpack.c.bf16 %v570_v42, %v401_v40  ;;  %2034 = vmatmul.msk.bf16.gmra.mxu1 %vm294_vm0, %v2520_v37  ;;  %2050 = vmatmul.msk.bf16.gmra.mxu3 %vm294_vm0, %v2210_v38 }
  0x8a   :  { %v480_v44 = vpop.f32.mrf.mxu2 }
  0x8b   :  { %1469 = vst [vmem:[#allocation2] sm:$0xff] %v1405_v43  ;;  %v481_v45 = vadd.f32 %v480_v44, %v2512_v35 }
  0x8c   :  { %v649_v46 = vpop.f32.mrf.mxu3  ;;  %v402_v48 = vpop.f32.mrf.mxu0 }
  0x8d   :  { %v650_v47 = vadd.f32 %v649_v46, %v2515_v36  ;;  %v403_v49 = vadd.f32 %v402_v48, %v2512_v35 }
  0x8e   :  { %v571_v50 = vpop.f32.mrf.mxu1 }
  0x8f   :  { %v1437_v51 = vpack.c.bf16 %v650_v47, %v481_v45  ;;  %v572_v52 = vadd.f32 %v571_v50, %v2515_v36  ;;  %v2213_v50 = vld [vmem:[%s3283_s0 + $0xd8] sm:$0xff] }
  0x91   :  { %1501 = vst [vmem:[#allocation2 + $0x100] sm:$0xff] %v1437_v51  ;;  %v1406_v53 = vpack.c.bf16 %v572_v52, %v403_v49  ;;  %v2585_v49 = vld [vmem:[%s3283_s0 + $0x58] sm:$0xff] }
  0x92   :  { %v482_v54 = vpop.f32.mrf.mxu2 }
  0x93   :  { %1470 = vst [vmem:[#allocation2 + $0x8] sm:$0xff] %v1406_v53  ;;  %v483_v55 = vadd.f32 %v482_v54, %v2512_v35 }
  0x94   :  { %v651_v56 = vpop.f32.mrf.mxu3  ;;  %v405_v60 = vpop.f32.mrf.mxu0 }
  0x95   :  { %v652_v59 = vadd.f32 %v651_v56, %v2515_v36  ;;  %v406_v61 = vadd.f32 %v405_v60, %v2512_v35 }
  0x96   :  { %v574_v62 = vpop.f32.mrf.mxu1 }
  0x97   :  { %v1438_v63 = vpack.c.bf16 %v652_v59, %v483_v55  ;;  %v575_v0 = vadd.f32 %v574_v62, %v2515_v36  ;;  %2003 = vmatmul.msk.bf16.gmra.mxu0 %vm294_vm0, %v2541_v57  ;;  %2019 = vmatmul.msk.bf16.gmra.mxu2 %vm294_vm0, %v2211_v58 }
  0x99   :  { %1502 = vst [vmem:[#allocation2 + $0x108] sm:$0xff] %v1438_v63  ;;  %v1407_v1 = vpack.c.bf16 %v575_v0, %v406_v61  ;;  %2035 = vmatmul.msk.bf16.gmra.mxu1 %vm294_vm0, %v2541_v57  ;;  %2051 = vmatmul.msk.bf16.gmra.mxu3 %vm294_vm0, %v2211_v58 }
  0x9a   :  { %v485_v2 = vpop.f32.mrf.mxu2 }
  0x9b   :  { %1471 = vst [vmem:[#allocation2 + $0x10] sm:$0xff] %v1407_v1  ;;  %v486_v3 = vadd.f32 %v485_v2, %v2512_v35 }
  0x9c   :  { %v654_v4 = vpop.f32.mrf.mxu3  ;;  %v407_v7 = vpop.f32.mrf.mxu0 }
  0x9d   :  { %v655_v6 = vadd.f32 %v654_v4, %v2515_v36  ;;  %v408_v8 = vadd.f32 %v407_v7, %v2512_v35 }
  0x9e   :  { %v576_v9 = vpop.f32.mrf.mxu1 }
  0x9f   :  { %v1439_v10 = vpack.c.bf16 %v655_v6, %v486_v3  ;;  %v577_v11 = vadd.f32 %v576_v9, %v2515_v36  ;;  %v2607_v9 = vld [vmem:[%s3283_s0 + $0x60] sm:$0xff] }
  0xa1   :  { %1503 = vst [vmem:[#allocation2 + $0x110] sm:$0xff] %v1439_v10  ;;  %v1408_v12 = vpack.c.bf16 %v577_v11, %v408_v8  ;;  %v2214_v10 = vld [vmem:[%s3283_s0 + $0xe0] sm:$0xff] }
  0xa2   :  { %v487_v13 = vpop.f32.mrf.mxu2 }
  0xa3   :  { %1472 = vst [vmem:[#allocation2 + $0x18] sm:$0xff] %v1408_v12  ;;  %v488_v14 = vadd.f32 %v487_v13, %v2512_v35 }
  0xa4   :  { %v656_v15 = vpop.f32.mrf.mxu3  ;;  %v410_v19 = vpop.f32.mrf.mxu0 }
  0xa5   :  { %v657_v18 = vadd.f32 %v656_v15, %v2515_v36  ;;  %v411_v21 = vadd.f32 %v410_v19, %v2512_v35 }
  0xa6   :  { %v579_v23 = vpop.f32.mrf.mxu1 }
  0xa7   :  { %v1440_v25 = vpack.c.bf16 %v657_v18, %v488_v14  ;;  %v580_v27 = vadd.f32 %v579_v23, %v2515_v36  ;;  %2004 = vmatmul.msk.bf16.gmra.mxu0 %vm294_vm0, %v2563_v16  ;;  %2020 = vmatmul.msk.bf16.gmra.mxu2 %vm294_vm0, %v2212_v17 }
  0xa9   :  { %1504 = vst [vmem:[#allocation2 + $0x118] sm:$0xff] %v1440_v25  ;;  %v1409_v29 = vpack.c.bf16 %v580_v27, %v411_v21  ;;  %2036 = vmatmul.msk.bf16.gmra.mxu1 %vm294_vm0, %v2563_v16  ;;  %2052 = vmatmul.msk.bf16.gmra.mxu3 %vm294_vm0, %v2212_v17 }
  0xaa   :  { %v490_v31 = vpop.f32.mrf.mxu2 }
  0xab   :  { %1473 = vst [vmem:[#allocation2 + $0x20] sm:$0xff] %v1409_v29  ;;  %v491_v33 = vadd.f32 %v490_v31, %v2512_v35 }
  0xac   :  { %v659_v38 = vpop.f32.mrf.mxu3  ;;  %v412_v40 = vpop.f32.mrf.mxu0 }
  0xad   :  { %v660_v39 = vadd.f32 %v659_v38, %v2515_v36  ;;  %v413_v41 = vadd.f32 %v412_v40, %v2512_v35 }
  0xae   :  { %v581_v42 = vpop.f32.mrf.mxu1 }
  0xaf   :  { %v1441_v43 = vpack.c.bf16 %v660_v39, %v491_v33  ;;  %v582_v44 = vadd.f32 %v581_v42, %v2515_v36 }
  0xb1   :  { %1505 = vst [vmem:[#allocation2 + $0x120] sm:$0xff] %v1441_v43  ;;  %v1410_v45 = vpack.c.bf16 %v582_v44, %v413_v41  ;;  %v2629_v43 = vld [vmem:[%s3283_s0 + $0x68] sm:$0xff] }
  0xb2   :  { %v492_v46 = vpop.f32.mrf.mxu2  ;;  %v2215_v44 = vld [vmem:[%s3283_s0 + $0xe8] sm:$0xff] }
  0xb3   :  { %1474 = vst [vmem:[#allocation2 + $0x28] sm:$0xff] %v1410_v45  ;;  %v493_v47 = vadd.f32 %v492_v46, %v2512_v35 }
  0xb4   :  { %v661_v48 = vpop.f32.mrf.mxu3  ;;  %v415_v52 = vpop.f32.mrf.mxu0 }
  0xb5   :  { %v662_v51 = vadd.f32 %v661_v48, %v2515_v36  ;;  %v416_v53 = vadd.f32 %v415_v52, %v2512_v35 }
  0xb6   :  { %v584_v54 = vpop.f32.mrf.mxu1 }
  0xb7   :  { %v1442_v55 = vpack.c.bf16 %v662_v51, %v493_v47  ;;  %v585_v56 = vadd.f32 %v584_v54, %v2515_v36  ;;  %2005 = vmatmul.msk.bf16.gmra.mxu0 %vm294_vm0, %v2585_v49  ;;  %2021 = vmatmul.msk.bf16.gmra.mxu2 %vm294_vm0, %v2213_v50 }
  0xb9   :  { %1506 = vst [vmem:[#allocation2 + $0x128] sm:$0xff] %v1442_v55  ;;  %v1411_v58 = vpack.c.bf16 %v585_v56, %v416_v53  ;;  %2037 = vmatmul.msk.bf16.gmra.mxu1 %vm294_vm0, %v2585_v49  ;;  %2053 = vmatmul.msk.bf16.gmra.mxu3 %vm294_vm0, %v2213_v50 }
  0xba   :  { %v495_v59 = vpop.f32.mrf.mxu2 }
  0xbb   :  { %1475 = vst [vmem:[#allocation2 + $0x30] sm:$0xff] %v1411_v58  ;;  %v496_v60 = vadd.f32 %v495_v59, %v2512_v35 }
  0xbc   :  { %v664_v61 = vpop.f32.mrf.mxu3  ;;  %v417_v63 = vpop.f32.mrf.mxu0 }
  0xbd   :  { %v665_v62 = vadd.f32 %v664_v61, %v2515_v36  ;;  %v418_v0 = vadd.f32 %v417_v63, %v2512_v35 }
  0xbe   :  { %v586_v1 = vpop.f32.mrf.mxu1 }
  0xbf   :  { %v1443_v2 = vpack.c.bf16 %v665_v62, %v496_v60  ;;  %v587_v3 = vadd.f32 %v586_v1, %v2515_v36 }
  0xc1   :  { %1507 = vst [vmem:[#allocation2 + $0x130] sm:$0xff] %v1443_v2  ;;  %v1412_v4 = vpack.c.bf16 %v587_v3, %v418_v0  ;;  %v2651_v3 = vld [vmem:[%s3283_s0 + $0x70] sm:$0xff] }
  0xc2   :  { %v497_v6 = vpop.f32.mrf.mxu2 }
  0xc3   :  { %1476 = vst [vmem:[#allocation2 + $0x38] sm:$0xff] %v1412_v4  ;;  %v498_v7 = vadd.f32 %v497_v6, %v2512_v35  ;;  %v2216_v4 = vld [vmem:[%s3283_s0 + $0xf0] sm:$0xff] }
  0xc4   :  { %v666_v8 = vpop.f32.mrf.mxu3  ;;  %v420_v12 = vpop.f32.mrf.mxu0 }
  0xc5   :  { %v667_v11 = vadd.f32 %v666_v8, %v2515_v36  ;;  %v421_v13 = vadd.f32 %v420_v12, %v2512_v35 }
  0xc6   :  { %v589_v14 = vpop.f32.mrf.mxu1 }
  0xc7   :  { %v1444_v15 = vpack.c.bf16 %v667_v11, %v498_v7  ;;  %v590_v17 = vadd.f32 %v589_v14, %v2515_v36  ;;  %2006 = vmatmul.msk.bf16.gmra.mxu0 %vm294_vm0, %v2607_v9  ;;  %2022 = vmatmul.msk.bf16.gmra.mxu2 %vm294_vm0, %v2214_v10 }
  0xc9   :  { %1508 = vst [vmem:[#allocation2 + $0x138] sm:$0xff] %v1444_v15  ;;  %v1413_v18 = vpack.c.bf16 %v590_v17, %v421_v13  ;;  %2038 = vmatmul.msk.bf16.gmra.mxu1 %vm294_vm0, %v2607_v9  ;;  %2054 = vmatmul.msk.bf16.gmra.mxu3 %vm294_vm0, %v2214_v10 }
  0xca   :  { %v500_v19 = vpop.f32.mrf.mxu2 }
  0xcb   :  { %1477 = vst [vmem:[#allocation2 + $0x40] sm:$0xff] %v1413_v18  ;;  %v501_v21 = vadd.f32 %v500_v19, %v2512_v35 }
  0xcc   :  { %v669_v23 = vpop.f32.mrf.mxu3  ;;  %v422_v27 = vpop.f32.mrf.mxu0 }
  0xcd   :  { %v670_v25 = vadd.f32 %v669_v23, %v2515_v36  ;;  %v423_v29 = vadd.f32 %v422_v27, %v2512_v35 }
  0xce   :  { %v591_v31 = vpop.f32.mrf.mxu1 }
  0xcf   :  { %v1445_v33 = vpack.c.bf16 %v670_v25, %v501_v21  ;;  %v592_v38 = vadd.f32 %v591_v31, %v2515_v36 }
  0xd1   :  { %1509 = vst [vmem:[#allocation2 + $0x140] sm:$0xff] %v1445_v33  ;;  %v1414_v39 = vpack.c.bf16 %v592_v38, %v423_v29 }
  0xd2   :  { %v502_v40 = vpop.f32.mrf.mxu2 }
  0xd3   :  { %1478 = vst [vmem:[#allocation2 + $0x48] sm:$0xff] %v1414_v39  ;;  %v503_v41 = vadd.f32 %v502_v40, %v2512_v35  ;;  %v2673_v39 = vld [vmem:[%s3283_s0 + $0x78] sm:$0xff] }
  0xd4   :  { %v671_v42 = vpop.f32.mrf.mxu3  ;;  %v425_v46 = vpop.f32.mrf.mxu0  ;;  %v2217_v40 = vld [vmem:[%s3283_s0 + $0xf8] sm:$0xff] }
  0xd5   :  { %v672_v45 = vadd.f32 %v671_v42, %v2515_v36  ;;  %v426_v47 = vadd.f32 %v425_v46, %v2512_v35 }
  0xd6   :  { %v594_v48 = vpop.f32.mrf.mxu1 }
  0xd7   :  { %v1446_v50 = vpack.c.bf16 %v672_v45, %v503_v41  ;;  %v595_v51 = vadd.f32 %v594_v48, %v2515_v36  ;;  %2007 = vmatmul.msk.bf16.gmra.mxu0 %vm294_vm0, %v2629_v43  ;;  %2023 = vmatmul.msk.bf16.gmra.mxu2 %vm294_vm0, %v2215_v44 }
  0xd9   :  { %1510 = vst [vmem:[#allocation2 + $0x148] sm:$0xff] %v1446_v50  ;;  %v1415_v52 = vpack.c.bf16 %v595_v51, %v426_v47  ;;  %2039 = vmatmul.msk.bf16.gmra.mxu1 %vm294_vm0, %v2629_v43  ;;  %2055 = vmatmul.msk.bf16.gmra.mxu3 %vm294_vm0, %v2215_v44 }
  0xda   :  { %v505_v53 = vpop.f32.mrf.mxu2 }
  0xdb   :  { %1479 = vst [vmem:[#allocation2 + $0x50] sm:$0xff] %v1415_v52  ;;  %v506_v54 = vadd.f32 %v505_v53, %v2512_v35 }
  0xdc   :  { %v674_v55 = vpop.f32.mrf.mxu3  ;;  %v427_v58 = vpop.f32.mrf.mxu0 }
  0xdd   :  { %v675_v56 = vadd.f32 %v674_v55, %v2515_v36  ;;  %v428_v59 = vadd.f32 %v427_v58, %v2512_v35 }
  0xde   :  { %v596_v60 = vpop.f32.mrf.mxu1 }
  0xdf   :  { %v1447_v61 = vpack.c.bf16 %v675_v56, %v506_v54  ;;  %v597_v62 = vadd.f32 %v596_v60, %v2515_v36 }
  0xe1   :  { %1511 = vst [vmem:[#allocation2 + $0x150] sm:$0xff] %v1447_v61  ;;  %v1416_v63 = vpack.c.bf16 %v597_v62, %v428_v59 }
  0xe2   :  { %v507_v0 = vpop.f32.mrf.mxu2 }
  0xe3   :  { %1480 = vst [vmem:[#allocation2 + $0x58] sm:$0xff] %v1416_v63  ;;  %v508_v1 = vadd.f32 %v507_v0, %v2512_v35 }
  0xe4   :  { %v676_v2 = vpop.f32.mrf.mxu3  ;;  %v430_v7 = vpop.f32.mrf.mxu0 }
  0xe5   :  { %v677_v6 = vadd.f32 %v676_v2, %v2515_v36  ;;  %v431_v8 = vadd.f32 %v430_v7, %v2512_v35 }
  0xe6   :  { %v599_v10 = vpop.f32.mrf.mxu1 }
  0xe7   :  { %v1448_v11 = vpack.c.bf16 %v677_v6, %v508_v1  ;;  %v600_v12 = vadd.f32 %v599_v10, %v2515_v36  ;;  %2008 = vmatmul.msk.bf16.gmra.mxu0 %vm294_vm0, %v2651_v3  ;;  %2024 = vmatmul.msk.bf16.gmra.mxu2 %vm294_vm0, %v2216_v4 }
  0xe9   :  { %1512 = vst [vmem:[#allocation2 + $0x158] sm:$0xff] %v1448_v11  ;;  %v1417_v13 = vpack.c.bf16 %v600_v12, %v431_v8  ;;  %2040 = vmatmul.msk.bf16.gmra.mxu1 %vm294_vm0, %v2651_v3  ;;  %2056 = vmatmul.msk.bf16.gmra.mxu3 %vm294_vm0, %v2216_v4 }
  0xea   :  { %v510_v14 = vpop.f32.mrf.mxu2 }
  0xeb   :  { %1481 = vst [vmem:[#allocation2 + $0x60] sm:$0xff] %v1417_v13  ;;  %v511_v15 = vadd.f32 %v510_v14, %v2512_v35 }
  0xec   :  { %v679_v17 = vpop.f32.mrf.mxu3  ;;  %v432_v19 = vpop.f32.mrf.mxu0 }
  0xed   :  { %v680_v18 = vadd.f32 %v679_v17, %v2515_v36  ;;  %v433_v21 = vadd.f32 %v432_v19, %v2512_v35 }
  0xee   :  { %v601_v23 = vpop.f32.mrf.mxu1 }
  0xef   :  { %v1449_v25 = vpack.c.bf16 %v680_v18, %v511_v15  ;;  %v602_v27 = vadd.f32 %v601_v23, %v2515_v36 }
  0xf1   :  { %1513 = vst [vmem:[#allocation2 + $0x160] sm:$0xff] %v1449_v25  ;;  %v1418_v29 = vpack.c.bf16 %v602_v27, %v433_v21 }
  0xf2   :  { %v512_v31 = vpop.f32.mrf.mxu2 }
  0xf3   :  { %1482 = vst [vmem:[#allocation2 + $0x68] sm:$0xff] %v1418_v29  ;;  %v513_v33 = vadd.f32 %v512_v31, %v2512_v35 }
  0xf4   :  { %v681_v38 = vpop.f32.mrf.mxu3  ;;  %v435_v42 = vpop.f32.mrf.mxu0 }
  0xf5   :  { %v682_v41 = vadd.f32 %v681_v38, %v2515_v36  ;;  %v436_v44 = vadd.f32 %v435_v42, %v2512_v35 }
  0xf6   :  { %v604_v45 = vpop.f32.mrf.mxu1 }
  0xf7   :  { %v1450_v46 = vpack.c.bf16 %v682_v41, %v513_v33  ;;  %v605_v47 = vadd.f32 %v604_v45, %v2515_v36  ;;  %2009 = vmatmul.msk.bf16.gmra.mxu0 %vm294_vm0, %v2673_v39  ;;  %2025 = vmatmul.msk.bf16.gmra.mxu2 %vm294_vm0, %v2217_v40 }
  0xf9   :  { %1514 = vst [vmem:[#allocation2 + $0x168] sm:$0xff] %v1450_v46  ;;  %v1419_v48 = vpack.c.bf16 %v605_v47, %v436_v44  ;;  %2041 = vmatmul.msk.bf16.gmra.mxu1 %vm294_vm0, %v2673_v39  ;;  %2057 = vmatmul.msk.bf16.gmra.mxu3 %vm294_vm0, %v2217_v40 }
  0xfa   :  { %v515_v50 = vpop.f32.mrf.mxu2 }
  0xfb   :  { %1483 = vst [vmem:[#allocation2 + $0x70] sm:$0xff] %v1419_v48  ;;  %v516_v51 = vadd.f32 %v515_v50, %v2512_v35 }
  0xfc   :  { %v684_v52 = vpop.f32.mrf.mxu3  ;;  %v437_v54 = vpop.f32.mrf.mxu0 }
  0xfd   :  { %v685_v53 = vadd.f32 %v684_v52, %v2515_v36  ;;  %v438_v55 = vadd.f32 %v437_v54, %v2512_v35 }
  0xfe   :  { %v606_v56 = vpop.f32.mrf.mxu1 }
  0xff   :  { %v1451_v58 = vpack.c.bf16 %v685_v53, %v516_v51  ;;  %v607_v59 = vadd.f32 %v606_v56, %v2515_v36 }
 0x101   :  { %1515 = vst [vmem:[#allocation2 + $0x170] sm:$0xff] %v1451_v58  ;;  %v1420_v60 = vpack.c.bf16 %v607_v59, %v438_v55 }
 0x102   :  { %v517_v61 = vpop.f32.mrf.mxu2 }
 0x103   :  { %1484 = vst [vmem:[#allocation2 + $0x78] sm:$0xff] %v1420_v60  ;;  %v518_v62 = vadd.f32 %v517_v61, %v2512_v35 }
 0x104   :  { %v686_v63 = vpop.f32.mrf.mxu3  ;;  %v440_v1 = vpop.f32.mrf.mxu0 }
 0x105   :  { %v687_v0 = vadd.f32 %v686_v63, %v2515_v36  ;;  %v441_v2 = vadd.f32 %v440_v1, %v2512_v35 }
 0x106   :  { %v609_v4 = vpop.f32.mrf.mxu1 }
 0x107   :  { %v1452_v6 = vpack.c.bf16 %v687_v0, %v518_v62  ;;  %v610_v7 = vadd.f32 %v609_v4, %v2515_v36  ;;  %2058 = vmatmul.msk.bf16.vlgmr.msrb.gmra.mxu2 %vm294_vm0, %v2373_v5  ;;  %2122 = vmatmul.msk.bf16.vlgmr.msrb.gmra.mxu0 %vm294_vm0, %v2373_v5 }
 0x109   :  { %1516 = vst [vmem:[#allocation2 + $0x178] sm:$0xff] %v1452_v6  ;;  %v1421_v8 = vpack.c.bf16 %v610_v7, %v441_v2  ;;  %2090 = vmatmul.msk.bf16.vlgmr.msrb.gmra.mxu3 %vm294_vm0, %v2373_v5  ;;  %2154 = vmatmul.msk.bf16.vlgmr.msrb.gmra.mxu1 %vm294_vm0, %v2373_v5 }
 0x10a   :  { %v520_v10 = vpop.f32.mrf.mxu2 }
 0x10b   :  { %1485 = vst [vmem:[#allocation2 + $0x80] sm:$0xff] %v1421_v8  ;;  %v521_v11 = vadd.f32 %v520_v10, %v2512_v35 }
 0x10c   :  { %v689_v12 = vpop.f32.mrf.mxu3  ;;  %v442_v14 = vpop.f32.mrf.mxu0 }
 0x10d   :  { %v690_v13 = vadd.f32 %v689_v12, %v2515_v36  ;;  %v443_v15 = vadd.f32 %v442_v14, %v2512_v35 }
 0x10e   :  { %v611_v17 = vpop.f32.mrf.mxu1 }
 0x10f   :  { %v1453_v18 = vpack.c.bf16 %v690_v13, %v521_v11  ;;  %v612_v19 = vadd.f32 %v611_v17, %v2515_v36 }
 0x111   :  { %1517 = vst [vmem:[#allocation2 + $0x180] sm:$0xff] %v1453_v18  ;;  %v1422_v21 = vpack.c.bf16 %v612_v19, %v443_v15 }
 0x112   :  { %v522_v23 = vpop.f32.mrf.mxu2 }
 0x113   :  { %1486 = vst [vmem:[#allocation2 + $0x88] sm:$0xff] %v1422_v21  ;;  %v523_v5 = vadd.f32 %v522_v23, %v2512_v35 }
 0x114   :  { %v691_v25 = vpop.f32.mrf.mxu3  ;;  %v445_v29 = vpop.f32.mrf.mxu0 }
 0x115   :  { %v692_v27 = vadd.f32 %v691_v25, %v2515_v36  ;;  %v446_v31 = vadd.f32 %v445_v29, %v2512_v35 }
 0x116   :  { %v614_v33 = vpop.f32.mrf.mxu1 }
 0x117   :  { %v1454_v38 = vpack.c.bf16 %v692_v27, %v523_v5  ;;  %v615_v40 = vadd.f32 %v614_v33, %v2515_v36  ;;  %2059 = vmatmul.msk.bf16.gmra.mxu2 %vm294_vm0, %v2411_v20  ;;  %2123 = vmatmul.msk.bf16.gmra.mxu0 %vm294_vm0, %v2411_v20 }
 0x119   :  { %1518 = vst [vmem:[#allocation2 + $0x188] sm:$0xff] %v1454_v38  ;;  %v1423_v41 = vpack.c.bf16 %v615_v40, %v446_v31  ;;  %2091 = vmatmul.msk.bf16.gmra.mxu3 %vm294_vm0, %v2411_v20  ;;  %2155 = vmatmul.msk.bf16.gmra.mxu1 %vm294_vm0, %v2411_v20 }
 0x11a   :  { %v525_v42 = vpop.f32.mrf.mxu2 }
 0x11b   :  { %1487 = vst [vmem:[#allocation2 + $0x90] sm:$0xff] %v1423_v41  ;;  %v526_v44 = vadd.f32 %v525_v42, %v2512_v35 }
 0x11c   :  { %v694_v45 = vpop.f32.mrf.mxu3  ;;  %v447_v47 = vpop.f32.mrf.mxu0 }
 0x11d   :  { %v695_v46 = vadd.f32 %v694_v45, %v2515_v36  ;;  %v448_v48 = vadd.f32 %v447_v47, %v2512_v35 }
 0x11e   :  { %v616_v50 = vpop.f32.mrf.mxu1 }
 0x11f   :  { %v1455_v51 = vpack.c.bf16 %v695_v46, %v526_v44  ;;  %v617_v52 = vadd.f32 %v616_v50, %v2515_v36 }
 0x121   :  { %1519 = vst [vmem:[#allocation2 + $0x190] sm:$0xff] %v1455_v51  ;;  %v1424_v53 = vpack.c.bf16 %v617_v52, %v448_v48 }
 0x122   :  { %v527_v54 = vpop.f32.mrf.mxu2 }
 0x123   :  { %1488 = vst [vmem:[#allocation2 + $0x98] sm:$0xff] %v1424_v53  ;;  %v528_v20 = vadd.f32 %v527_v54, %v2512_v35 }
 0x124   :  { %v696_v55 = vpop.f32.mrf.mxu3  ;;  %v450_v58 = vpop.f32.mrf.mxu0 }
 0x125   :  { %v697_v56 = vadd.f32 %v696_v55, %v2515_v36  ;;  %v451_v59 = vadd.f32 %v450_v58, %v2512_v35 }
 0x126   :  { %v619_v60 = vpop.f32.mrf.mxu1 }
 0x127   :  { %v1456_v61 = vpack.c.bf16 %v697_v56, %v528_v20  ;;  %v620_v62 = vadd.f32 %v619_v60, %v2515_v36  ;;  %2060 = vmatmul.msk.bf16.gmra.mxu2 %vm294_vm0, %v2425_v22  ;;  %2124 = vmatmul.msk.bf16.gmra.mxu0 %vm294_vm0, %v2425_v22 }
 0x129   :  { %1520 = vst [vmem:[#allocation2 + $0x198] sm:$0xff] %v1456_v61  ;;  %v1425_v63 = vpack.c.bf16 %v620_v62, %v451_v59  ;;  %2092 = vmatmul.msk.bf16.gmra.mxu3 %vm294_vm0, %v2425_v22  ;;  %2156 = vmatmul.msk.bf16.gmra.mxu1 %vm294_vm0, %v2425_v22 }
 0x12a   :  { %v530_v0 = vpop.f32.mrf.mxu2 }
 0x12b   :  { %1489 = vst [vmem:[#allocation2 + $0xa0] sm:$0xff] %v1425_v63  ;;  %v531_v1 = vadd.f32 %v530_v0, %v2512_v35 }
 0x12c   :  { %v699_v2 = vpop.f32.mrf.mxu3  ;;  %v452_v6 = vpop.f32.mrf.mxu0 }
 0x12d   :  { %v700_v4 = vadd.f32 %v699_v2, %v2515_v36  ;;  %v453_v7 = vadd.f32 %v452_v6, %v2512_v35 }
 0x12e   :  { %v621_v8 = vpop.f32.mrf.mxu1 }
 0x12f   :  { %v1457_v10 = vpack.c.bf16 %v700_v4, %v531_v1  ;;  %v622_v11 = vadd.f32 %v621_v8, %v2515_v36 }
 0x131   :  { %1521 = vst [vmem:[#allocation2 + $0x1a0] sm:$0xff] %v1457_v10  ;;  %v1426_v12 = vpack.c.bf16 %v622_v11, %v453_v7 }
 0x132   :  { %v532_v13 = vpop.f32.mrf.mxu2 }
 0x133   :  { %1490 = vst [vmem:[#allocation2 + $0xa8] sm:$0xff] %v1426_v12  ;;  %v533_v22 = vadd.f32 %v532_v13, %v2512_v35 }
 0x134   :  { %v701_v14 = vpop.f32.mrf.mxu3  ;;  %v455_v17 = vpop.f32.mrf.mxu0 }
 0x135   :  { %v702_v15 = vadd.f32 %v701_v14, %v2515_v36  ;;  %v456_v18 = vadd.f32 %v455_v17, %v2512_v35 }
 0x136   :  { %v624_v19 = vpop.f32.mrf.mxu1 }
 0x137   :  { %v1458_v21 = vpack.c.bf16 %v702_v15, %v533_v22  ;;  %v625_v23 = vadd.f32 %v624_v19, %v2515_v36  ;;  %2061 = vmatmul.msk.bf16.gmra.mxu2 %vm294_vm0, %v2439_v24  ;;  %2125 = vmatmul.msk.bf16.gmra.mxu0 %vm294_vm0, %v2439_v24 }
 0x139   :  { %1522 = vst [vmem:[#allocation2 + $0x1a8] sm:$0xff] %v1458_v21  ;;  %v1427_v5 = vpack.c.bf16 %v625_v23, %v456_v18  ;;  %2093 = vmatmul.msk.bf16.gmra.mxu3 %vm294_vm0, %v2439_v24  ;;  %2157 = vmatmul.msk.bf16.gmra.mxu1 %vm294_vm0, %v2439_v24 }
 0x13a   :  { %v535_v25 = vpop.f32.mrf.mxu2 }
 0x13b   :  { %1491 = vst [vmem:[#allocation2 + $0xb0] sm:$0xff] %v1427_v5  ;;  %v536_v27 = vadd.f32 %v535_v25, %v2512_v35 }
 0x13c   :  { %v704_v29 = vpop.f32.mrf.mxu3  ;;  %v457_v33 = vpop.f32.mrf.mxu0 }
 0x13d   :  { %v705_v31 = vadd.f32 %v704_v29, %v2515_v36  ;;  %v458_v38 = vadd.f32 %v457_v33, %v2512_v35 }
 0x13e   :  { %v626_v40 = vpop.f32.mrf.mxu1 }
 0x13f   :  { %v1459_v41 = vpack.c.bf16 %v705_v31, %v536_v27  ;;  %v627_v42 = vadd.f32 %v626_v40, %v2515_v36 }
 0x141   :  { %1523 = vst [vmem:[#allocation2 + $0x1b0] sm:$0xff] %v1459_v41  ;;  %v1428_v44 = vpack.c.bf16 %v627_v42, %v458_v38 }
 0x142   :  { %v537_v45 = vpop.f32.mrf.mxu2 }
 0x143   :  { %1492 = vst [vmem:[#allocation2 + $0xb8] sm:$0xff] %v1428_v44  ;;  %v538_v24 = vadd.f32 %v537_v45, %v2512_v35 }
 0x144   :  { %v706_v46 = vpop.f32.mrf.mxu3  ;;  %v460_v48 = vpop.f32.mrf.mxu0 }
 0x145   :  { %v707_v47 = vadd.f32 %v706_v46, %v2515_v36  ;;  %v461_v50 = vadd.f32 %v460_v48, %v2512_v35 }
 0x146   :  { %v629_v51 = vpop.f32.mrf.mxu1 }
 0x147   :  { %v1460_v52 = vpack.c.bf16 %v707_v47, %v538_v24  ;;  %v630_v53 = vadd.f32 %v629_v51, %v2515_v36  ;;  %2062 = vmatmul.msk.bf16.gmra.mxu2 %vm294_vm0, %v2453_v26  ;;  %2126 = vmatmul.msk.bf16.gmra.mxu0 %vm294_vm0, %v2453_v26 }
 0x149   :  { %1524 = vst [vmem:[#allocation2 + $0x1b8] sm:$0xff] %v1460_v52  ;;  %v1429_v54 = vpack.c.bf16 %v630_v53, %v461_v50  ;;  %2094 = vmatmul.msk.bf16.gmra.mxu3 %vm294_vm0, %v2453_v26  ;;  %2158 = vmatmul.msk.bf16.gmra.mxu1 %vm294_vm0, %v2453_v26 }
 0x14a   :  { %v540_v20 = vpop.f32.mrf.mxu2 }
 0x14b   :  { %1493 = vst [vmem:[#allocation2 + $0xc0] sm:$0xff] %v1429_v54  ;;  %v541_v55 = vadd.f32 %v540_v20, %v2512_v35 }
 0x14c   :  { %v709_v56 = vpop.f32.mrf.mxu3  ;;  %v462_v59 = vpop.f32.mrf.mxu0 }
 0x14d   :  { %v710_v58 = vadd.f32 %v709_v56, %v2515_v36  ;;  %v463_v60 = vadd.f32 %v462_v59, %v2512_v35 }
 0x14e   :  { %v631_v61 = vpop.f32.mrf.mxu1 }
 0x14f   :  { %v1461_v62 = vpack.c.bf16 %v710_v58, %v541_v55  ;;  %v632_v63 = vadd.f32 %v631_v61, %v2515_v36 }
 0x151   :  { %1525 = vst [vmem:[#allocation2 + $0x1c0] sm:$0xff] %v1461_v62  ;;  %v1430_v0 = vpack.c.bf16 %v632_v63, %v463_v60 }
 0x152   :  { %v542_v1 = vpop.f32.mrf.mxu2 }
 0x153   :  { %1494 = vst [vmem:[#allocation2 + $0xc8] sm:$0xff] %v1430_v0  ;;  %v543_v26 = vadd.f32 %v542_v1, %v2512_v35 }
 0x154   :  { %v711_v2 = vpop.f32.mrf.mxu3  ;;  %v465_v6 = vpop.f32.mrf.mxu0 }
 0x155   :  { %v712_v4 = vadd.f32 %v711_v2, %v2515_v36  ;;  %v466_v7 = vadd.f32 %v465_v6, %v2512_v35 }
 0x156   :  { %v634_v8 = vpop.f32.mrf.mxu1 }
 0x157   :  { %v1462_v10 = vpack.c.bf16 %v712_v4, %v543_v26  ;;  %v635_v11 = vadd.f32 %v634_v8, %v2515_v36  ;;  %2063 = vmatmul.msk.bf16.gmra.mxu2 %vm294_vm0, %v2467_v28  ;;  %2127 = vmatmul.msk.bf16.gmra.mxu0 %vm294_vm0, %v2467_v28 }
 0x159   :  { %1526 = vst [vmem:[#allocation2 + $0x1c8] sm:$0xff] %v1462_v10  ;;  %v1431_v12 = vpack.c.bf16 %v635_v11, %v466_v7  ;;  %2095 = vmatmul.msk.bf16.gmra.mxu3 %vm294_vm0, %v2467_v28  ;;  %2159 = vmatmul.msk.bf16.gmra.mxu1 %vm294_vm0, %v2467_v28  ;;  %v2820_v11 = vperm.slane %v2509_v34, 4 }
 0x15a   :  { %v545_v13 = vpop.f32.mrf.mxu2 }
 0x15b   :  { %1495 = vst [vmem:[#allocation2 + $0xd0] sm:$0xff] %v1431_v12  ;;  %v546_v22 = vadd.f32 %v545_v13, %v2512_v35  ;;  %v2823_v12 = vperm.slane %v2509_v34, 5 }
 0x15c   :  { %v714_v14 = vpop.f32.mrf.mxu3  ;;  %v467_v17 = vpop.f32.mrf.mxu0 }
 0x15d   :  { %v715_v15 = vadd.f32 %v714_v14, %v2515_v36  ;;  %v468_v18 = vadd.f32 %v467_v17, %v2512_v35 }
 0x15e   :  { %v636_v19 = vpop.f32.mrf.mxu1 }
 0x15f   :  { %v1463_v21 = vpack.c.bf16 %v715_v15, %v546_v22  ;;  %v637_v23 = vadd.f32 %v636_v19, %v2515_v36 }
 0x161   :  { %1527 = vst [vmem:[#allocation2 + $0x1d0] sm:$0xff] %v1463_v21  ;;  %v1432_v5 = vpack.c.bf16 %v637_v23, %v468_v18  ;;  %v2834_v23 = vperm.slane %v2509_v34, 2 }
 0x162   :  { %v547_v25 = vpop.f32.mrf.mxu2 }
 0x163   :  { %1496 = vst [vmem:[#allocation2 + $0xd8] sm:$0xff] %v1432_v5  ;;  %v548_v28 = vadd.f32 %v547_v25, %v2512_v35 }
 0x164   :  { %v716_v27 = vpop.f32.mrf.mxu3  ;;  %v470_v31 = vpop.f32.mrf.mxu0 }
 0x165   :  { %v717_v29 = vadd.f32 %v716_v27, %v2515_v36  ;;  %v471_v33 = vadd.f32 %v470_v31, %v2512_v35 }
 0x166   :  { %v639_v38 = vpop.f32.mrf.mxu1 }
 0x167   :  { %v1464_v40 = vpack.c.bf16 %v717_v29, %v548_v28  ;;  %v640_v41 = vadd.f32 %v639_v38, %v2515_v36  ;;  %2064 = vmatmul.msk.bf16.gmra.mxu2 %vm294_vm0, %v2481_v30  ;;  %2128 = vmatmul.msk.bf16.gmra.mxu0 %vm294_vm0, %v2481_v30 }
 0x169   :  { %1528 = vst [vmem:[#allocation2 + $0x1d8] sm:$0xff] %v1464_v40  ;;  %v1433_v42 = vpack.c.bf16 %v640_v41, %v471_v33  ;;  %2096 = vmatmul.msk.bf16.gmra.mxu3 %vm294_vm0, %v2481_v30  ;;  %2160 = vmatmul.msk.bf16.gmra.mxu1 %vm294_vm0, %v2481_v30 }
 0x16a   :  { %v550_v44 = vpop.f32.mrf.mxu2 }
 0x16b   :  { %1497 = vst [vmem:[#allocation2 + $0xe0] sm:$0xff] %v1433_v42  ;;  %v551_v45 = vadd.f32 %v550_v44, %v2512_v35 }
 0x16c   :  { %v719_v24 = vpop.f32.mrf.mxu3  ;;  %v472_v47 = vpop.f32.mrf.mxu0 }
 0x16d   :  { %v720_v46 = vadd.f32 %v719_v24, %v2515_v36  ;;  %v473_v48 = vadd.f32 %v472_v47, %v2512_v35 }
 0x16e   :  { %v641_v50 = vpop.f32.mrf.mxu1 }
 0x16f   :  { %v1465_v51 = vpack.c.bf16 %v720_v46, %v551_v45  ;;  %v642_v52 = vadd.f32 %v641_v50, %v2515_v36 }
 0x171   :  { %1529 = vst [vmem:[#allocation2 + $0x1e0] sm:$0xff] %v1465_v51  ;;  %v1434_v53 = vpack.c.bf16 %v642_v52, %v473_v48 }
 0x172   :  { %v552_v54 = vpop.f32.mrf.mxu2 }
 0x173   :  { %1498 = vst [vmem:[#allocation2 + $0xe8] sm:$0xff] %v1434_v53  ;;  %v553_v30 = vadd.f32 %v552_v54, %v2512_v35 }
 0x174   :  { %v721_v20 = vpop.f32.mrf.mxu3  ;;  %v475_v56 = vpop.f32.mrf.mxu0 }
 0x175   :  { %v722_v55 = vadd.f32 %v721_v20, %v2515_v36  ;;  %v476_v58 = vadd.f32 %v475_v56, %v2512_v35 }
 0x176   :  { %v644_v59 = vpop.f32.mrf.mxu1 }
 0x177   :  { %v1466_v60 = vpack.c.bf16 %v722_v55, %v553_v30  ;;  %v645_v61 = vadd.f32 %v644_v59, %v2515_v36  ;;  %2065 = vmatmul.msk.bf16.gmra.mxu2 %vm294_vm0, %v2495_v32  ;;  %2129 = vmatmul.msk.bf16.gmra.mxu0 %vm294_vm0, %v2495_v32 }
 0x179   :  { %1530 = vst [vmem:[#allocation2 + $0x1e8] sm:$0xff] %v1466_v60  ;;  %v1435_v62 = vpack.c.bf16 %v645_v61, %v476_v58  ;;  %2097 = vmatmul.msk.bf16.gmra.mxu3 %vm294_vm0, %v2495_v32  ;;  %2161 = vmatmul.msk.bf16.gmra.mxu1 %vm294_vm0, %v2495_v32 }
 0x17a   :  { %v555_v63 = vpop.f32.mrf.mxu2 }
 0x17b   :  { %1499 = vst [vmem:[#allocation2 + $0xf0] sm:$0xff] %v1435_v62  ;;  %v556_v0 = vadd.f32 %v555_v63, %v2512_v35 }
 0x17c   :  { %v724_v1 = vpop.f32.mrf.mxu3  ;;  %v477_v2 = vpop.f32.mrf.mxu0 }
 0x17d   :  { %v725_v26 = vadd.f32 %v724_v1, %v2515_v36  ;;  %v478_v4 = vadd.f32 %v477_v2, %v2512_v35 }
 0x17e   :  { %v646_v6 = vpop.f32.mrf.mxu1 }
 0x17f   :  { %v1467_v7 = vpack.c.bf16 %v725_v26, %v556_v0  ;;  %v647_v8 = vadd.f32 %v646_v6, %v2515_v36 }
 0x181   :  { %1531 = vst [vmem:[#allocation2 + $0x1f0] sm:$0xff] %v1467_v7  ;;  %v1436_v10 = vpack.c.bf16 %v647_v8, %v478_v4 }
 0x182   :  { %v557_v32 = vpop.f32.mrf.mxu2 }
 0x183   :  { %1500 = vst [vmem:[#allocation2 + $0xf8] sm:$0xff] %v1436_v10  ;;  %v558_v13 = vadd.f32 %v557_v32, %v2512_v35 }
 0x184   :  { %v726_v22 = vpop.f32.mrf.mxu3  ;;  %v1076_v15 = vpop.f32.mrf.mxu0 }
 0x185   :  { %v727_v14 = vadd.f32 %v726_v22, %v2515_v36  ;;  %v1077_v17 = vadd.f32 %v1076_v15, %v2820_v11  ;;  %v2841_v36 = vperm.slane %v2509_v34, 3 }
 0x186   :  { %v1245_v18 = vpop.f32.mrf.mxu1 }
 0x187   :  { %v1468_v19 = vpack.c.bf16 %v727_v14, %v558_v13  ;;  %v1246_v21 = vadd.f32 %v1245_v18, %v2823_v12  ;;  %2066 = vmatmul.msk.bf16.gmra.mxu2 %vm294_vm0, %v2520_v37  ;;  %2130 = vmatmul.msk.bf16.gmra.mxu0 %vm294_vm0, %v2520_v37 }
 0x189   :  { %1532 = vst [vmem:[#allocation2 + $0x1f8] sm:$0xff] %v1468_v19  ;;  %v1661_v35 = vpack.c.bf16 %v1246_v21, %v1077_v17  ;;  %2098 = vmatmul.msk.bf16.gmra.mxu3 %vm294_vm0, %v2520_v37  ;;  %2162 = vmatmul.msk.bf16.gmra.mxu1 %vm294_vm0, %v2520_v37 }
 0x18a   :  { %v738_v5 = vpop.f32.mrf.mxu2  ;;  %1801 = dma.vmem_to_hbm [thread:$0]  %s1794_s11, 8192, %s1796_s9, [#allocation3], %s2324_s12, %s2324_s12, %s2325_s13  }
 0x18b   :  { %1725 = vst [vmem:[#allocation6] sm:$0xff] %v1661_v35  ;;  %v739_v25 = vadd.f32 %v738_v5, %v2834_v23 }
 0x18c   :  { %v907_v28 = vpop.f32.mrf.mxu3  ;;  %v1078_v29 = vpop.f32.mrf.mxu0 }
 0x18d   :  { %v908_v27 = vadd.f32 %v907_v28, %v2841_v36  ;;  %v1079_v31 = vadd.f32 %v1078_v29, %v2820_v11 }
 0x18e   :  { %v1247_v33 = vpop.f32.mrf.mxu1 }
 0x18f   :  { %v1533_v38 = vpack.c.bf16 %v908_v27, %v739_v25  ;;  %v1248_v40 = vadd.f32 %v1247_v33, %v2823_v12 }
 0x191   :  { %1597 = vst [vmem:[#allocation4] sm:$0xff] %v1533_v38  ;;  %v1662_v41 = vpack.c.bf16 %v1248_v40, %v1079_v31 }
 0x192   :  { %v740_v37 = vpop.f32.mrf.mxu2 }
 0x193   :  { %1726 = vst [vmem:[#allocation6 + $0x8] sm:$0xff] %v1662_v41  ;;  %v741_v34 = vadd.f32 %v740_v37, %v2834_v23 }
 0x194   :  { %v909_v42 = vpop.f32.mrf.mxu3  ;;  %v1081_v45 = vpop.f32.mrf.mxu0 }
 0x195   :  { %v910_v44 = vadd.f32 %v909_v42, %v2841_v36  ;;  %v1082_v24 = vadd.f32 %v1081_v45, %v2820_v11 }
 0x196   :  { %v1250_v46 = vpop.f32.mrf.mxu1 }
 0x197   :  { %v1534_v47 = vpack.c.bf16 %v910_v44, %v741_v34  ;;  %v1251_v48 = vadd.f32 %v1250_v46, %v2823_v12  ;;  %2067 = vmatmul.msk.bf16.gmra.mxu2 %vm294_vm0, %v2541_v57  ;;  %2131 = vmatmul.msk.bf16.gmra.mxu0 %vm294_vm0, %v2541_v57 }
 0x199   :  { %1598 = vst [vmem:[#allocation4 + $0x8] sm:$0xff] %v1534_v47  ;;  %v1663_v50 = vpack.c.bf16 %v1251_v48, %v1082_v24  ;;  %2099 = vmatmul.msk.bf16.gmra.mxu3 %vm294_vm0, %v2541_v57  ;;  %2163 = vmatmul.msk.bf16.gmra.mxu1 %vm294_vm0, %v2541_v57 }
 0x19a   :  { %v743_v51 = vpop.f32.mrf.mxu2 }
 0x19b   :  { %1727 = vst [vmem:[#allocation6 + $0x10] sm:$0xff] %v1663_v50  ;;  %v744_v52 = vadd.f32 %v743_v51, %v2834_v23 }
 0x19c   :  { %v912_v53 = vpop.f32.mrf.mxu3  ;;  %v1083_v30 = vpop.f32.mrf.mxu0 }
 0x19d   :  { %v913_v54 = vadd.f32 %v912_v53, %v2841_v36  ;;  %v1084_v20 = vadd.f32 %v1083_v30, %v2820_v11 }
 0x19e   :  { %v1252_v55 = vpop.f32.mrf.mxu1 }
 0x19f   :  { %v1535_v56 = vpack.c.bf16 %v913_v54, %v744_v52  ;;  %v1253_v58 = vadd.f32 %v1252_v55, %v2823_v12 }
 0x1a1   :  { %1599 = vst [vmem:[#allocation4 + $0x10] sm:$0xff] %v1535_v56  ;;  %v1664_v59 = vpack.c.bf16 %v1253_v58, %v1084_v20 }
 0x1a2   :  { %v745_v60 = vpop.f32.mrf.mxu2 }
 0x1a3   :  { %1728 = vst [vmem:[#allocation6 + $0x18] sm:$0xff] %v1664_v59  ;;  %v746_v57 = vadd.f32 %v745_v60, %v2834_v23 }
 0x1a4   :  { %v914_v61 = vpop.f32.mrf.mxu3  ;;  %v1086_v63 = vpop.f32.mrf.mxu0 }
 0x1a5   :  { %v915_v62 = vadd.f32 %v914_v61, %v2841_v36  ;;  %v1087_v0 = vadd.f32 %v1086_v63, %v2820_v11 }
 0x1a6   :  { %v1255_v1 = vpop.f32.mrf.mxu1 }
 0x1a7   :  { %v1536_v26 = vpack.c.bf16 %v915_v62, %v746_v57  ;;  %v1256_v2 = vadd.f32 %v1255_v1, %v2823_v12  ;;  %2068 = vmatmul.msk.bf16.gmra.mxu2 %vm294_vm0, %v2563_v16  ;;  %2132 = vmatmul.msk.bf16.gmra.mxu0 %vm294_vm0, %v2563_v16 }
 0x1a9   :  { %1600 = vst [vmem:[#allocation4 + $0x18] sm:$0xff] %v1536_v26  ;;  %v1665_v4 = vpack.c.bf16 %v1256_v2, %v1087_v0  ;;  %2100 = vmatmul.msk.bf16.gmra.mxu3 %vm294_vm0, %v2563_v16  ;;  %2164 = vmatmul.msk.bf16.gmra.mxu1 %vm294_vm0, %v2563_v16 }
 0x1aa   :  { %v748_v6 = vpop.f32.mrf.mxu2 }
 0x1ab   :  { %1729 = vst [vmem:[#allocation6 + $0x20] sm:$0xff] %v1665_v4  ;;  %v749_v7 = vadd.f32 %v748_v6, %v2834_v23 }
 0x1ac   :  { %v917_v8 = vpop.f32.mrf.mxu3  ;;  %v1088_v32 = vpop.f32.mrf.mxu0 }
 0x1ad   :  { %v918_v10 = vadd.f32 %v917_v8, %v2841_v36  ;;  %v1089_v13 = vadd.f32 %v1088_v32, %v2820_v11 }
 0x1ae   :  { %v1257_v22 = vpop.f32.mrf.mxu1 }
 0x1af   :  { %v1537_v14 = vpack.c.bf16 %v918_v10, %v749_v7  ;;  %v1258_v15 = vadd.f32 %v1257_v22, %v2823_v12 }
 0x1b1   :  { %1601 = vst [vmem:[#allocation4 + $0x20] sm:$0xff] %v1537_v14  ;;  %v1666_v17 = vpack.c.bf16 %v1258_v15, %v1089_v13 }
 0x1b2   :  { %v750_v18 = vpop.f32.mrf.mxu2 }
 0x1b3   :  { %1730 = vst [vmem:[#allocation6 + $0x28] sm:$0xff] %v1666_v17  ;;  %v751_v16 = vadd.f32 %v750_v18, %v2834_v23 }
 0x1b4   :  { %v919_v19 = vpop.f32.mrf.mxu3  ;;  %v1091_v35 = vpop.f32.mrf.mxu0 }
 0x1b5   :  { %v920_v21 = vadd.f32 %v919_v19, %v2841_v36  ;;  %v1092_v5 = vadd.f32 %v1091_v35, %v2820_v11 }
 0x1b6   :  { %v1260_v25 = vpop.f32.mrf.mxu1 }
 0x1b7   :  { %v1538_v28 = vpack.c.bf16 %v920_v21, %v751_v16  ;;  %v1261_v27 = vadd.f32 %v1260_v25, %v2823_v12  ;;  %2069 = vmatmul.msk.bf16.gmra.mxu2 %vm294_vm0, %v2585_v49  ;;  %2133 = vmatmul.msk.bf16.gmra.mxu0 %vm294_vm0, %v2585_v49 }
 0x1b9   :  { %1602 = vst [vmem:[#allocation4 + $0x28] sm:$0xff] %v1538_v28  ;;  %v1667_v29 = vpack.c.bf16 %v1261_v27, %v1092_v5  ;;  %2101 = vmatmul.msk.bf16.gmra.mxu3 %vm294_vm0, %v2585_v49  ;;  %2165 = vmatmul.msk.bf16.gmra.mxu1 %vm294_vm0, %v2585_v49 }
 0x1ba   :  { %v753_v31 = vpop.f32.mrf.mxu2 }
 0x1bb   :  { %1731 = vst [vmem:[#allocation6 + $0x30] sm:$0xff] %v1667_v29  ;;  %v754_v33 = vadd.f32 %v753_v31, %v2834_v23 }
 0x1bc   :  { %v922_v38 = vpop.f32.mrf.mxu3  ;;  %v1093_v41 = vpop.f32.mrf.mxu0 }
 0x1bd   :  { %v923_v40 = vadd.f32 %v922_v38, %v2841_v36  ;;  %v1094_v37 = vadd.f32 %v1093_v41, %v2820_v11 }
 0x1be   :  { %v1262_v34 = vpop.f32.mrf.mxu1 }
 0x1bf   :  { %v1539_v42 = vpack.c.bf16 %v923_v40, %v754_v33  ;;  %v1263_v44 = vadd.f32 %v1262_v34, %v2823_v12 }
 0x1c1   :  { %1603 = vst [vmem:[#allocation4 + $0x30] sm:$0xff] %v1539_v42  ;;  %v1668_v45 = vpack.c.bf16 %v1263_v44, %v1094_v37 }
 0x1c2   :  { %v755_v24 = vpop.f32.mrf.mxu2 }
 0x1c3   :  { %1732 = vst [vmem:[#allocation6 + $0x38] sm:$0xff] %v1668_v45  ;;  %v756_v49 = vadd.f32 %v755_v24, %v2834_v23 }
 0x1c4   :  { %v924_v46 = vpop.f32.mrf.mxu3  ;;  %v1096_v48 = vpop.f32.mrf.mxu0 }
 0x1c5   :  { %v925_v47 = vadd.f32 %v924_v46, %v2841_v36  ;;  %v1097_v50 = vadd.f32 %v1096_v48, %v2820_v11 }
 0x1c6   :  { %v1265_v51 = vpop.f32.mrf.mxu1 }
 0x1c7   :  { %v1540_v52 = vpack.c.bf16 %v925_v47, %v756_v49  ;;  %v1266_v53 = vadd.f32 %v1265_v51, %v2823_v12  ;;  %2070 = vmatmul.msk.bf16.gmra.mxu2 %vm294_vm0, %v2607_v9  ;;  %2134 = vmatmul.msk.bf16.gmra.mxu0 %vm294_vm0, %v2607_v9 }
 0x1c9   :  { %1604 = vst [vmem:[#allocation4 + $0x38] sm:$0xff] %v1540_v52  ;;  %v1669_v54 = vpack.c.bf16 %v1266_v53, %v1097_v50  ;;  %2102 = vmatmul.msk.bf16.gmra.mxu3 %vm294_vm0, %v2607_v9  ;;  %2166 = vmatmul.msk.bf16.gmra.mxu1 %vm294_vm0, %v2607_v9 }
 0x1ca   :  { %v758_v30 = vpop.f32.mrf.mxu2 }
 0x1cb   :  { %1733 = vst [vmem:[#allocation6 + $0x40] sm:$0xff] %v1669_v54  ;;  %v759_v20 = vadd.f32 %v758_v30, %v2834_v23 }
 0x1cc   :  { %v927_v55 = vpop.f32.mrf.mxu3  ;;  %v1098_v58 = vpop.f32.mrf.mxu0 }
 0x1cd   :  { %v928_v56 = vadd.f32 %v927_v55, %v2841_v36  ;;  %v1099_v59 = vadd.f32 %v1098_v58, %v2820_v11 }
 0x1ce   :  { %v1267_v60 = vpop.f32.mrf.mxu1 }
 0x1cf   :  { %v1541_v57 = vpack.c.bf16 %v928_v56, %v759_v20  ;;  %v1268_v61 = vadd.f32 %v1267_v60, %v2823_v12 }
 0x1d1   :  { %1605 = vst [vmem:[#allocation4 + $0x40] sm:$0xff] %v1541_v57  ;;  %v1670_v62 = vpack.c.bf16 %v1268_v61, %v1099_v59 }
 0x1d2   :  { %v760_v63 = vpop.f32.mrf.mxu2 }
 0x1d3   :  { %1734 = vst [vmem:[#allocation6 + $0x48] sm:$0xff] %v1670_v62  ;;  %v761_v9 = vadd.f32 %v760_v63, %v2834_v23 }
 0x1d4   :  { %v929_v0 = vpop.f32.mrf.mxu3  ;;  %v1101_v26 = vpop.f32.mrf.mxu0 }
 0x1d5   :  { %v930_v1 = vadd.f32 %v929_v0, %v2841_v36  ;;  %v1102_v2 = vadd.f32 %v1101_v26, %v2820_v11 }
 0x1d6   :  { %v1270_v4 = vpop.f32.mrf.mxu1 }
 0x1d7   :  { %v1542_v6 = vpack.c.bf16 %v930_v1, %v761_v9  ;;  %v1271_v7 = vadd.f32 %v1270_v4, %v2823_v12  ;;  %2071 = vmatmul.msk.bf16.gmra.mxu2 %vm294_vm0, %v2629_v43  ;;  %2135 = vmatmul.msk.bf16.gmra.mxu0 %vm294_vm0, %v2629_v43 }
 0x1d9   :  { %1606 = vst [vmem:[#allocation4 + $0x48] sm:$0xff] %v1542_v6  ;;  %v1671_v8 = vpack.c.bf16 %v1271_v7, %v1102_v2  ;;  %2103 = vmatmul.msk.bf16.gmra.mxu3 %vm294_vm0, %v2629_v43  ;;  %2167 = vmatmul.msk.bf16.gmra.mxu1 %vm294_vm0, %v2629_v43 }
 0x1da   :  { %v763_v10 = vpop.f32.mrf.mxu2 }
 0x1db   :  { %1735 = vst [vmem:[#allocation6 + $0x50] sm:$0xff] %v1671_v8  ;;  %v764_v32 = vadd.f32 %v763_v10, %v2834_v23  ;;  %v2231_v8 = vld [vmem:[%s3283_s0 + $0x80] sm:$0xff] }
 0x1dc   :  { %v932_v13 = vpop.f32.mrf.mxu3  ;;  %v1103_v14 = vpop.f32.mrf.mxu0 }
 0x1dd   :  { %v933_v22 = vadd.f32 %v932_v13, %v2841_v36  ;;  %v1104_v15 = vadd.f32 %v1103_v14, %v2820_v11 }
 0x1de   :  { %v1272_v17 = vpop.f32.mrf.mxu1 }
 0x1df   :  { %v1543_v18 = vpack.c.bf16 %v933_v22, %v764_v32  ;;  %v1273_v16 = vadd.f32 %v1272_v17, %v2823_v12 }
 0x1e1   :  { %1607 = vst [vmem:[#allocation4 + $0x50] sm:$0xff] %v1543_v18  ;;  %v1672_v19 = vpack.c.bf16 %v1273_v16, %v1104_v15 }
 0x1e2   :  { %v765_v21 = vpop.f32.mrf.mxu2 }
 0x1e3   :  { %1736 = vst [vmem:[#allocation6 + $0x58] sm:$0xff] %v1672_v19  ;;  %v766_v43 = vadd.f32 %v765_v21, %v2834_v23 }
 0x1e4   :  { %v934_v35 = vpop.f32.mrf.mxu3  ;;  %v1106_v25 = vpop.f32.mrf.mxu0 }
 0x1e5   :  { %v935_v5 = vadd.f32 %v934_v35, %v2841_v36  ;;  %v1107_v28 = vadd.f32 %v1106_v25, %v2820_v11 }
 0x1e6   :  { %v1275_v27 = vpop.f32.mrf.mxu1 }
 0x1e7   :  { %v1544_v29 = vpack.c.bf16 %v935_v5, %v766_v43  ;;  %v1276_v31 = vadd.f32 %v1275_v27, %v2823_v12  ;;  %2072 = vmatmul.msk.bf16.gmra.mxu2 %vm294_vm0, %v2651_v3  ;;  %2136 = vmatmul.msk.bf16.gmra.mxu0 %vm294_vm0, %v2651_v3 }
 0x1e9   :  { %1608 = vst [vmem:[#allocation4 + $0x58] sm:$0xff] %v1544_v29  ;;  %v1673_v33 = vpack.c.bf16 %v1276_v31, %v1107_v28  ;;  %2104 = vmatmul.msk.bf16.gmra.mxu3 %vm294_vm0, %v2651_v3  ;;  %2168 = vmatmul.msk.bf16.gmra.mxu1 %vm294_vm0, %v2651_v3 }
 0x1ea   :  { %v768_v38 = vpop.f32.mrf.mxu2 }
 0x1eb   :  { %1737 = vst [vmem:[#allocation6 + $0x60] sm:$0xff] %v1673_v33  ;;  %v769_v40 = vadd.f32 %v768_v38, %v2834_v23  ;;  %v2232_v38 = vld [vmem:[%s3283_s0 + $0x88] sm:$0xff] }
 0x1ec   :  { %v937_v41 = vpop.f32.mrf.mxu3  ;;  %v1108_v34 = vpop.f32.mrf.mxu0 }
 0x1ed   :  { %v938_v37 = vadd.f32 %v937_v41, %v2841_v36  ;;  %v1109_v42 = vadd.f32 %v1108_v34, %v2820_v11 }
 0x1ee   :  { %v1277_v44 = vpop.f32.mrf.mxu1 }
 0x1ef   :  { %v1545_v45 = vpack.c.bf16 %v938_v37, %v769_v40  ;;  %v1278_v24 = vadd.f32 %v1277_v44, %v2823_v12 }
 0x1f1   :  { %1609 = vst [vmem:[#allocation4 + $0x60] sm:$0xff] %v1545_v45  ;;  %v1674_v49 = vpack.c.bf16 %v1278_v24, %v1109_v42 }
 0x1f2   :  { %v770_v46 = vpop.f32.mrf.mxu2 }
 0x1f3   :  { %1738 = vst [vmem:[#allocation6 + $0x68] sm:$0xff] %v1674_v49  ;;  %v771_v3 = vadd.f32 %v770_v46, %v2834_v23 }
 0x1f4   :  { %v939_v47 = vpop.f32.mrf.mxu3  ;;  %v1111_v50 = vpop.f32.mrf.mxu0 }
 0x1f5   :  { %v940_v48 = vadd.f32 %v939_v47, %v2841_v36  ;;  %v1112_v51 = vadd.f32 %v1111_v50, %v2820_v11 }
 0x1f6   :  { %v1280_v52 = vpop.f32.mrf.mxu1 }
 0x1f7   :  { %v1546_v53 = vpack.c.bf16 %v940_v48, %v771_v3  ;;  %v1281_v54 = vadd.f32 %v1280_v52, %v2823_v12  ;;  %2073 = vmatmul.msk.bf16.gmra.mxu2 %vm294_vm0, %v2673_v39  ;;  %2137 = vmatmul.msk.bf16.gmra.mxu0 %vm294_vm0, %v2673_v39 }
 0x1f9   :  { %1610 = vst [vmem:[#allocation4 + $0x68] sm:$0xff] %v1546_v53  ;;  %v1675_v30 = vpack.c.bf16 %v1281_v54, %v1112_v51  ;;  %2105 = vmatmul.msk.bf16.gmra.mxu3 %vm294_vm0, %v2673_v39  ;;  %2169 = vmatmul.msk.bf16.gmra.mxu1 %vm294_vm0, %v2673_v39 }
 0x1fa   :  { %v773_v20 = vpop.f32.mrf.mxu2 }
 0x1fb   :  { %1739 = vst [vmem:[#allocation6 + $0x70] sm:$0xff] %v1675_v30  ;;  %v774_v55 = vadd.f32 %v773_v20, %v2834_v23 }
 0x1fc   :  { %v942_v56 = vpop.f32.mrf.mxu3  ;;  %v1113_v59 = vpop.f32.mrf.mxu0 }
 0x1fd   :  { %v943_v58 = vadd.f32 %v942_v56, %v2841_v36  ;;  %v1114_v60 = vadd.f32 %v1113_v59, %v2820_v11 }
 0x1fe   :  { %v1282_v57 = vpop.f32.mrf.mxu1 }
 0x1ff   :  { %v1547_v61 = vpack.c.bf16 %v943_v58, %v774_v55  ;;  %v1283_v62 = vadd.f32 %v1282_v57, %v2823_v12  ;;  %v2233_v55 = vld [vmem:[%s3283_s0 + $0x90] sm:$0xff] }
 0x201   :  { %1611 = vst [vmem:[#allocation4 + $0x70] sm:$0xff] %v1547_v61  ;;  %v1676_v63 = vpack.c.bf16 %v1283_v62, %v1114_v60 }
 0x202   :  { %v775_v9 = vpop.f32.mrf.mxu2 }
 0x203   :  { %1740 = vst [vmem:[#allocation6 + $0x78] sm:$0xff] %v1676_v63  ;;  %v776_v39 = vadd.f32 %v775_v9, %v2834_v23 }
 0x204   :  { %v944_v0 = vpop.f32.mrf.mxu3  ;;  %v1116_v26 = vpop.f32.mrf.mxu0 }
 0x205   :  { %v945_v1 = vadd.f32 %v944_v0, %v2841_v36  ;;  %v1117_v2 = vadd.f32 %v1116_v26, %v2820_v11 }
 0x206   :  { %v1285_v4 = vpop.f32.mrf.mxu1 }
 0x207   :  { %v1548_v6 = vpack.c.bf16 %v945_v1, %v776_v39  ;;  %v1286_v7 = vadd.f32 %v1285_v4, %v2823_v12  ;;  %2074 = vmatmul.msk.bf16.gmra.mxu2 %vm294_vm0, %v2231_v8  ;;  %2138 = vmatmul.msk.bf16.gmra.mxu0 %vm294_vm0, %v2231_v8 }
 0x209   :  { %1612 = vst [vmem:[#allocation4 + $0x78] sm:$0xff] %v1548_v6  ;;  %v1677_v10 = vpack.c.bf16 %v1286_v7, %v1117_v2  ;;  %2106 = vmatmul.msk.bf16.gmra.mxu3 %vm294_vm0, %v2231_v8  ;;  %2170 = vmatmul.msk.bf16.gmra.mxu1 %vm294_vm0, %v2231_v8 }
 0x20a   :  { %v778_v32 = vpop.f32.mrf.mxu2 }
 0x20b   :  { %1741 = vst [vmem:[#allocation6 + $0x80] sm:$0xff] %v1677_v10  ;;  %v779_v13 = vadd.f32 %v778_v32, %v2834_v23 }
 0x20c   :  { %v947_v22 = vpop.f32.mrf.mxu3  ;;  %v1118_v15 = vpop.f32.mrf.mxu0 }
 0x20d   :  { %v948_v14 = vadd.f32 %v947_v22, %v2841_v36  ;;  %v1119_v17 = vadd.f32 %v1118_v15, %v2820_v11 }
 0x20e   :  { %v1287_v18 = vpop.f32.mrf.mxu1 }
 0x20f   :  { %v1549_v16 = vpack.c.bf16 %v948_v14, %v779_v13  ;;  %v1288_v19 = vadd.f32 %v1287_v18, %v2823_v12  ;;  %v2234_v13 = vld [vmem:[%s3283_s0 + $0x98] sm:$0xff] }
 0x211   :  { %1613 = vst [vmem:[#allocation4 + $0x80] sm:$0xff] %v1549_v16  ;;  %v1678_v21 = vpack.c.bf16 %v1288_v19, %v1119_v17 }
 0x212   :  { %v780_v43 = vpop.f32.mrf.mxu2 }
 0x213   :  { %1742 = vst [vmem:[#allocation6 + $0x88] sm:$0xff] %v1678_v21  ;;  %v781_v35 = vadd.f32 %v780_v43, %v2834_v23 }
 0x214   :  { %v949_v5 = vpop.f32.mrf.mxu3  ;;  %v1121_v28 = vpop.f32.mrf.mxu0 }
 0x215   :  { %v950_v25 = vadd.f32 %v949_v5, %v2841_v36  ;;  %v1122_v27 = vadd.f32 %v1121_v28, %v2820_v11 }
 0x216   :  { %v1290_v29 = vpop.f32.mrf.mxu1 }
 0x217   :  { %v1550_v31 = vpack.c.bf16 %v950_v25, %v781_v35  ;;  %v1291_v33 = vadd.f32 %v1290_v29, %v2823_v12  ;;  %2075 = vmatmul.msk.bf16.gmra.mxu2 %vm294_vm0, %v2232_v38  ;;  %2139 = vmatmul.msk.bf16.gmra.mxu0 %vm294_vm0, %v2232_v38 }
 0x219   :  { %1614 = vst [vmem:[#allocation4 + $0x88] sm:$0xff] %v1550_v31  ;;  %v1679_v40 = vpack.c.bf16 %v1291_v33, %v1122_v27  ;;  %2107 = vmatmul.msk.bf16.gmra.mxu3 %vm294_vm0, %v2232_v38  ;;  %2171 = vmatmul.msk.bf16.gmra.mxu1 %vm294_vm0, %v2232_v38 }
 0x21a   :  { %v783_v41 = vpop.f32.mrf.mxu2 }
 0x21b   :  { %1743 = vst [vmem:[#allocation6 + $0x90] sm:$0xff] %v1679_v40  ;;  %v784_v37 = vadd.f32 %v783_v41, %v2834_v23 }
 0x21c   :  { %v952_v34 = vpop.f32.mrf.mxu3  ;;  %v1123_v44 = vpop.f32.mrf.mxu0 }
 0x21d   :  { %v953_v42 = vadd.f32 %v952_v34, %v2841_v36  ;;  %v1124_v45 = vadd.f32 %v1123_v44, %v2820_v11 }
 0x21e   :  { %v1292_v24 = vpop.f32.mrf.mxu1 }
 0x21f   :  { %v1551_v49 = vpack.c.bf16 %v953_v42, %v784_v37  ;;  %v1293_v46 = vadd.f32 %v1292_v24, %v2823_v12  ;;  %v2235_v37 = vld [vmem:[%s3283_s0 + $0xa0] sm:$0xff] }
 0x221   :  { %1615 = vst [vmem:[#allocation4 + $0x90] sm:$0xff] %v1551_v49  ;;  %v1680_v3 = vpack.c.bf16 %v1293_v46, %v1124_v45 }
 0x222   :  { %v785_v47 = vpop.f32.mrf.mxu2 }
 0x223   :  { %1744 = vst [vmem:[#allocation6 + $0x98] sm:$0xff] %v1680_v3  ;;  %v786_v48 = vadd.f32 %v785_v47, %v2834_v23 }
 0x224   :  { %v954_v50 = vpop.f32.mrf.mxu3  ;;  %v1126_v52 = vpop.f32.mrf.mxu0 }
 0x225   :  { %v955_v51 = vadd.f32 %v954_v50, %v2841_v36  ;;  %v1127_v53 = vadd.f32 %v1126_v52, %v2820_v11 }
 0x226   :  { %v1295_v54 = vpop.f32.mrf.mxu1 }
 0x227   :  { %v1552_v30 = vpack.c.bf16 %v955_v51, %v786_v48  ;;  %v1296_v20 = vadd.f32 %v1295_v54, %v2823_v12  ;;  %2076 = vmatmul.msk.bf16.gmra.mxu2 %vm294_vm0, %v2233_v55  ;;  %2140 = vmatmul.msk.bf16.gmra.mxu0 %vm294_vm0, %v2233_v55 }
 0x229   :  { %1616 = vst [vmem:[#allocation4 + $0x98] sm:$0xff] %v1552_v30  ;;  %v1681_v56 = vpack.c.bf16 %v1296_v20, %v1127_v53  ;;  %2108 = vmatmul.msk.bf16.gmra.mxu3 %vm294_vm0, %v2233_v55  ;;  %2172 = vmatmul.msk.bf16.gmra.mxu1 %vm294_vm0, %v2233_v55 }
 0x22a   :  { %v788_v58 = vpop.f32.mrf.mxu2 }
 0x22b   :  { %1745 = vst [vmem:[#allocation6 + $0xa0] sm:$0xff] %v1681_v56  ;;  %v789_v59 = vadd.f32 %v788_v58, %v2834_v23 }
 0x22c   :  { %v957_v60 = vpop.f32.mrf.mxu3  ;;  %v1128_v61 = vpop.f32.mrf.mxu0 }
 0x22d   :  { %v958_v57 = vadd.f32 %v957_v60, %v2841_v36  ;;  %v1129_v62 = vadd.f32 %v1128_v61, %v2820_v11 }
 0x22e   :  { %v1297_v63 = vpop.f32.mrf.mxu1 }
 0x22f   :  { %v1553_v9 = vpack.c.bf16 %v958_v57, %v789_v59  ;;  %v1298_v39 = vadd.f32 %v1297_v63, %v2823_v12  ;;  %v2236_v59 = vld [vmem:[%s3283_s0 + $0xa8] sm:$0xff] }
 0x231   :  { %1617 = vst [vmem:[#allocation4 + $0xa0] sm:$0xff] %v1553_v9  ;;  %v1682_v0 = vpack.c.bf16 %v1298_v39, %v1129_v62 }
 0x232   :  { %v790_v1 = vpop.f32.mrf.mxu2 }
 0x233   :  { %1746 = vst [vmem:[#allocation6 + $0xa8] sm:$0xff] %v1682_v0  ;;  %v791_v26 = vadd.f32 %v790_v1, %v2834_v23 }
 0x234   :  { %v959_v2 = vpop.f32.mrf.mxu3  ;;  %v1131_v6 = vpop.f32.mrf.mxu0 }
 0x235   :  { %v960_v4 = vadd.f32 %v959_v2, %v2841_v36  ;;  %v1132_v7 = vadd.f32 %v1131_v6, %v2820_v11 }
 0x236   :  { %v1300_v8 = vpop.f32.mrf.mxu1 }
 0x237   :  { %v1554_v10 = vpack.c.bf16 %v960_v4, %v791_v26  ;;  %v1301_v32 = vadd.f32 %v1300_v8, %v2823_v12  ;;  %2077 = vmatmul.msk.bf16.gmra.mxu2 %vm294_vm0, %v2234_v13  ;;  %2141 = vmatmul.msk.bf16.gmra.mxu0 %vm294_vm0, %v2234_v13 }
 0x239   :  { %1618 = vst [vmem:[#allocation4 + $0xa8] sm:$0xff] %v1554_v10  ;;  %v1683_v22 = vpack.c.bf16 %v1301_v32, %v1132_v7  ;;  %2109 = vmatmul.msk.bf16.gmra.mxu3 %vm294_vm0, %v2234_v13  ;;  %2173 = vmatmul.msk.bf16.gmra.mxu1 %vm294_vm0, %v2234_v13 }
 0x23a   :  { %v793_v14 = vpop.f32.mrf.mxu2 }
 0x23b   :  { %1747 = vst [vmem:[#allocation6 + $0xb0] sm:$0xff] %v1683_v22  ;;  %v794_v15 = vadd.f32 %v793_v14, %v2834_v23 }
 0x23c   :  { %v962_v17 = vpop.f32.mrf.mxu3  ;;  %v1133_v16 = vpop.f32.mrf.mxu0 }
 0x23d   :  { %v963_v18 = vadd.f32 %v962_v17, %v2841_v36  ;;  %v1134_v19 = vadd.f32 %v1133_v16, %v2820_v11 }
 0x23e   :  { %v1302_v21 = vpop.f32.mrf.mxu1 }
 0x23f   :  { %v1555_v43 = vpack.c.bf16 %v963_v18, %v794_v15  ;;  %v1303_v35 = vadd.f32 %v1302_v21, %v2823_v12  ;;  %v2237_v15 = vld [vmem:[%s3283_s0 + $0xb0] sm:$0xff] }
 0x241   :  { %1619 = vst [vmem:[#allocation4 + $0xb0] sm:$0xff] %v1555_v43  ;;  %v1684_v5 = vpack.c.bf16 %v1303_v35, %v1134_v19 }
 0x242   :  { %v795_v25 = vpop.f32.mrf.mxu2 }
 0x243   :  { %1748 = vst [vmem:[#allocation6 + $0xb8] sm:$0xff] %v1684_v5  ;;  %v796_v28 = vadd.f32 %v795_v25, %v2834_v23 }
 0x244   :  { %v964_v27 = vpop.f32.mrf.mxu3  ;;  %v1136_v31 = vpop.f32.mrf.mxu0 }
 0x245   :  { %v965_v29 = vadd.f32 %v964_v27, %v2841_v36  ;;  %v1137_v33 = vadd.f32 %v1136_v31, %v2820_v11 }
 0x246   :  { %v1305_v38 = vpop.f32.mrf.mxu1 }
 0x247   :  { %v1556_v40 = vpack.c.bf16 %v965_v29, %v796_v28  ;;  %v1306_v41 = vadd.f32 %v1305_v38, %v2823_v12  ;;  %2078 = vmatmul.msk.bf16.gmra.mxu2 %vm294_vm0, %v2235_v37  ;;  %2142 = vmatmul.msk.bf16.gmra.mxu0 %vm294_vm0, %v2235_v37 }
 0x249   :  { %1620 = vst [vmem:[#allocation4 + $0xb8] sm:$0xff] %v1556_v40  ;;  %v1685_v34 = vpack.c.bf16 %v1306_v41, %v1137_v33  ;;  %2110 = vmatmul.msk.bf16.gmra.mxu3 %vm294_vm0, %v2235_v37  ;;  %2174 = vmatmul.msk.bf16.gmra.mxu1 %vm294_vm0, %v2235_v37 }
 0x24a   :  { %v798_v42 = vpop.f32.mrf.mxu2 }
 0x24b   :  { %1749 = vst [vmem:[#allocation6 + $0xc0] sm:$0xff] %v1685_v34  ;;  %v799_v44 = vadd.f32 %v798_v42, %v2834_v23 }
 0x24c   :  { %v967_v45 = vpop.f32.mrf.mxu3  ;;  %v1138_v49 = vpop.f32.mrf.mxu0 }
 0x24d   :  { %v968_v24 = vadd.f32 %v967_v45, %v2841_v36  ;;  %v1139_v46 = vadd.f32 %v1138_v49, %v2820_v11 }
 0x24e   :  { %v1307_v3 = vpop.f32.mrf.mxu1 }
 0x24f   :  { %v1557_v47 = vpack.c.bf16 %v968_v24, %v799_v44  ;;  %v1308_v48 = vadd.f32 %v1307_v3, %v2823_v12  ;;  %v2238_v44 = vld [vmem:[%s3283_s0 + $0xb8] sm:$0xff] }
 0x251   :  { %1621 = vst [vmem:[#allocation4 + $0xc0] sm:$0xff] %v1557_v47  ;;  %v1686_v50 = vpack.c.bf16 %v1308_v48, %v1139_v46 }
 0x252   :  { %v800_v51 = vpop.f32.mrf.mxu2 }
 0x253   :  { %1750 = vst [vmem:[#allocation6 + $0xc8] sm:$0xff] %v1686_v50  ;;  %v801_v52 = vadd.f32 %v800_v51, %v2834_v23 }
 0x254   :  { %v969_v53 = vpop.f32.mrf.mxu3  ;;  %v1141_v30 = vpop.f32.mrf.mxu0 }
 0x255   :  { %v970_v54 = vadd.f32 %v969_v53, %v2841_v36  ;;  %v1142_v20 = vadd.f32 %v1141_v30, %v2820_v11 }
 0x256   :  { %v1310_v55 = vpop.f32.mrf.mxu1 }
 0x257   :  { %v1558_v56 = vpack.c.bf16 %v970_v54, %v801_v52  ;;  %v1311_v58 = vadd.f32 %v1310_v55, %v2823_v12  ;;  %2079 = vmatmul.msk.bf16.gmra.mxu2 %vm294_vm0, %v2236_v59  ;;  %2143 = vmatmul.msk.bf16.gmra.mxu0 %vm294_vm0, %v2236_v59 }
 0x259   :  { %1622 = vst [vmem:[#allocation4 + $0xc8] sm:$0xff] %v1558_v56  ;;  %v1687_v60 = vpack.c.bf16 %v1311_v58, %v1142_v20  ;;  %2111 = vmatmul.msk.bf16.gmra.mxu3 %vm294_vm0, %v2236_v59  ;;  %2175 = vmatmul.msk.bf16.gmra.mxu1 %vm294_vm0, %v2236_v59 }
 0x25a   :  { %v803_v57 = vpop.f32.mrf.mxu2 }
 0x25b   :  { %1751 = vst [vmem:[#allocation6 + $0xd0] sm:$0xff] %v1687_v60  ;;  %v804_v61 = vadd.f32 %v803_v57, %v2834_v23 }
 0x25c   :  { %v972_v62 = vpop.f32.mrf.mxu3  ;;  %v1143_v9 = vpop.f32.mrf.mxu0 }
 0x25d   :  { %v973_v63 = vadd.f32 %v972_v62, %v2841_v36  ;;  %v1144_v39 = vadd.f32 %v1143_v9, %v2820_v11 }
 0x25e   :  { %v1312_v0 = vpop.f32.mrf.mxu1 }
 0x25f   :  { %v1559_v1 = vpack.c.bf16 %v973_v63, %v804_v61  ;;  %v1313_v26 = vadd.f32 %v1312_v0, %v2823_v12  ;;  %v2239_v61 = vld [vmem:[%s3283_s0 + $0xc0] sm:$0xff] }
 0x261   :  { %1623 = vst [vmem:[#allocation4 + $0xd0] sm:$0xff] %v1559_v1  ;;  %v1688_v2 = vpack.c.bf16 %v1313_v26, %v1144_v39 }
 0x262   :  { %v805_v4 = vpop.f32.mrf.mxu2 }
 0x263   :  { %1752 = vst [vmem:[#allocation6 + $0xd8] sm:$0xff] %v1688_v2  ;;  %v806_v6 = vadd.f32 %v805_v4, %v2834_v23 }
 0x264   :  { %v974_v7 = vpop.f32.mrf.mxu3  ;;  %v1146_v10 = vpop.f32.mrf.mxu0 }
 0x265   :  { %v975_v8 = vadd.f32 %v974_v7, %v2841_v36  ;;  %v1147_v32 = vadd.f32 %v1146_v10, %v2820_v11 }
 0x266   :  { %v1315_v13 = vpop.f32.mrf.mxu1 }
 0x267   :  { %v1560_v22 = vpack.c.bf16 %v975_v8, %v806_v6  ;;  %v1316_v14 = vadd.f32 %v1315_v13, %v2823_v12  ;;  %2080 = vmatmul.msk.bf16.gmra.mxu2 %vm294_vm0, %v2237_v15  ;;  %2144 = vmatmul.msk.bf16.gmra.mxu0 %vm294_vm0, %v2237_v15 }
 0x269   :  { %1624 = vst [vmem:[#allocation4 + $0xd8] sm:$0xff] %v1560_v22  ;;  %v1689_v17 = vpack.c.bf16 %v1316_v14, %v1147_v32  ;;  %2112 = vmatmul.msk.bf16.gmra.mxu3 %vm294_vm0, %v2237_v15  ;;  %2176 = vmatmul.msk.bf16.gmra.mxu1 %vm294_vm0, %v2237_v15 }
 0x26a   :  { %v808_v18 = vpop.f32.mrf.mxu2 }
 0x26b   :  { %1753 = vst [vmem:[#allocation6 + $0xe0] sm:$0xff] %v1689_v17  ;;  %v809_v16 = vadd.f32 %v808_v18, %v2834_v23 }
 0x26c   :  { %v977_v19 = vpop.f32.mrf.mxu3  ;;  %v1148_v43 = vpop.f32.mrf.mxu0 }
 0x26d   :  { %v978_v21 = vadd.f32 %v977_v19, %v2841_v36  ;;  %v1149_v35 = vadd.f32 %v1148_v43, %v2820_v11 }
 0x26e   :  { %v1317_v5 = vpop.f32.mrf.mxu1 }
 0x26f   :  { %v1561_v25 = vpack.c.bf16 %v978_v21, %v809_v16  ;;  %v1318_v28 = vadd.f32 %v1317_v5, %v2823_v12  ;;  %v2240_v16 = vld [vmem:[%s3283_s0 + $0xc8] sm:$0xff] }
 0x271   :  { %1625 = vst [vmem:[#allocation4 + $0xe0] sm:$0xff] %v1561_v25  ;;  %v1690_v27 = vpack.c.bf16 %v1318_v28, %v1149_v35 }
 0x272   :  { %v810_v29 = vpop.f32.mrf.mxu2 }
 0x273   :  { %1754 = vst [vmem:[#allocation6 + $0xe8] sm:$0xff] %v1690_v27  ;;  %v811_v31 = vadd.f32 %v810_v29, %v2834_v23 }
 0x274   :  { %v979_v33 = vpop.f32.mrf.mxu3  ;;  %v1151_v40 = vpop.f32.mrf.mxu0 }
 0x275   :  { %v980_v38 = vadd.f32 %v979_v33, %v2841_v36  ;;  %v1152_v41 = vadd.f32 %v1151_v40, %v2820_v11 }
 0x276   :  { %v1320_v37 = vpop.f32.mrf.mxu1 }
 0x277   :  { %v1562_v34 = vpack.c.bf16 %v980_v38, %v811_v31  ;;  %v1321_v42 = vadd.f32 %v1320_v37, %v2823_v12  ;;  %2081 = vmatmul.msk.bf16.gmra.mxu2 %vm294_vm0, %v2238_v44  ;;  %2145 = vmatmul.msk.bf16.gmra.mxu0 %vm294_vm0, %v2238_v44 }
 0x279   :  { %1626 = vst [vmem:[#allocation4 + $0xe8] sm:$0xff] %v1562_v34  ;;  %v1691_v45 = vpack.c.bf16 %v1321_v42, %v1152_v41  ;;  %2113 = vmatmul.msk.bf16.gmra.mxu3 %vm294_vm0, %v2238_v44  ;;  %2177 = vmatmul.msk.bf16.gmra.mxu1 %vm294_vm0, %v2238_v44 }
 0x27a   :  { %v813_v24 = vpop.f32.mrf.mxu2 }
 0x27b   :  { %1755 = vst [vmem:[#allocation6 + $0xf0] sm:$0xff] %v1691_v45  ;;  %v814_v49 = vadd.f32 %v813_v24, %v2834_v23 }
 0x27c   :  { %v982_v46 = vpop.f32.mrf.mxu3  ;;  %v1153_v47 = vpop.f32.mrf.mxu0 }
 0x27d   :  { %v983_v3 = vadd.f32 %v982_v46, %v2841_v36  ;;  %v1154_v48 = vadd.f32 %v1153_v47, %v2820_v11 }
 0x27e   :  { %v1322_v50 = vpop.f32.mrf.mxu1 }
 0x27f   :  { %v1563_v51 = vpack.c.bf16 %v983_v3, %v814_v49  ;;  %v1323_v52 = vadd.f32 %v1322_v50, %v2823_v12  ;;  %v2241_v49 = vld [vmem:[%s3283_s0 + $0xd0] sm:$0xff] }
 0x281   :  { %1627 = vst [vmem:[#allocation4 + $0xf0] sm:$0xff] %v1563_v51  ;;  %v1692_v53 = vpack.c.bf16 %v1323_v52, %v1154_v48 }
 0x282   :  { %v815_v54 = vpop.f32.mrf.mxu2 }
 0x283   :  { %1756 = vst [vmem:[#allocation6 + $0xf8] sm:$0xff] %v1692_v53  ;;  %v816_v30 = vadd.f32 %v815_v54, %v2834_v23 }
 0x284   :  { %v984_v20 = vpop.f32.mrf.mxu3  ;;  %v1156_v56 = vpop.f32.mrf.mxu0 }
 0x285   :  { %v985_v55 = vadd.f32 %v984_v20, %v2841_v36  ;;  %v1157_v58 = vadd.f32 %v1156_v56, %v2820_v11 }
 0x286   :  { %v1325_v59 = vpop.f32.mrf.mxu1 }
 0x287   :  { %v1564_v60 = vpack.c.bf16 %v985_v55, %v816_v30  ;;  %v1326_v57 = vadd.f32 %v1325_v59, %v2823_v12  ;;  %2082 = vmatmul.msk.bf16.gmra.mxu2 %vm294_vm0, %v2239_v61  ;;  %2146 = vmatmul.msk.bf16.gmra.mxu0 %vm294_vm0, %v2239_v61 }
 0x289   :  { %1628 = vst [vmem:[#allocation4 + $0xf8] sm:$0xff] %v1564_v60  ;;  %v1693_v62 = vpack.c.bf16 %v1326_v57, %v1157_v58  ;;  %2114 = vmatmul.msk.bf16.gmra.mxu3 %vm294_vm0, %v2239_v61  ;;  %2178 = vmatmul.msk.bf16.gmra.mxu1 %vm294_vm0, %v2239_v61 }
 0x28a   :  { %v818_v63 = vpop.f32.mrf.mxu2 }
 0x28b   :  { %1757 = vst [vmem:[#allocation6 + $0x100] sm:$0xff] %v1693_v62  ;;  %v819_v9 = vadd.f32 %v818_v63, %v2834_v23 }
 0x28c   :  { %v987_v39 = vpop.f32.mrf.mxu3  ;;  %v1158_v1 = vpop.f32.mrf.mxu0 }
 0x28d   :  { %v988_v0 = vadd.f32 %v987_v39, %v2841_v36  ;;  %v1159_v26 = vadd.f32 %v1158_v1, %v2820_v11 }
 0x28e   :  { %v1327_v2 = vpop.f32.mrf.mxu1 }
 0x28f   :  { %v1565_v4 = vpack.c.bf16 %v988_v0, %v819_v9  ;;  %v1328_v6 = vadd.f32 %v1327_v2, %v2823_v12  ;;  %v2242_v9 = vld [vmem:[%s3283_s0 + $0xd8] sm:$0xff] }
 0x291   :  { %1629 = vst [vmem:[#allocation4 + $0x100] sm:$0xff] %v1565_v4  ;;  %v1694_v7 = vpack.c.bf16 %v1328_v6, %v1159_v26 }
 0x292   :  { %v820_v8 = vpop.f32.mrf.mxu2 }
 0x293   :  { %1758 = vst [vmem:[#allocation6 + $0x108] sm:$0xff] %v1694_v7  ;;  %v821_v10 = vadd.f32 %v820_v8, %v2834_v23 }
 0x294   :  { %v989_v32 = vpop.f32.mrf.mxu3  ;;  %v1161_v22 = vpop.f32.mrf.mxu0 }
 0x295   :  { %v990_v13 = vadd.f32 %v989_v32, %v2841_v36  ;;  %v1162_v14 = vadd.f32 %v1161_v22, %v2820_v11 }
 0x296   :  { %v1330_v15 = vpop.f32.mrf.mxu1 }
 0x297   :  { %v1566_v17 = vpack.c.bf16 %v990_v13, %v821_v10  ;;  %v1331_v18 = vadd.f32 %v1330_v15, %v2823_v12  ;;  %2083 = vmatmul.msk.bf16.gmra.mxu2 %vm294_vm0, %v2240_v16  ;;  %2147 = vmatmul.msk.bf16.gmra.mxu0 %vm294_vm0, %v2240_v16 }
 0x299   :  { %1630 = vst [vmem:[#allocation4 + $0x108] sm:$0xff] %v1566_v17  ;;  %v1695_v19 = vpack.c.bf16 %v1331_v18, %v1162_v14  ;;  %2115 = vmatmul.msk.bf16.gmra.mxu3 %vm294_vm0, %v2240_v16  ;;  %2179 = vmatmul.msk.bf16.gmra.mxu1 %vm294_vm0, %v2240_v16 }
 0x29a   :  { %v823_v21 = vpop.f32.mrf.mxu2 }
 0x29b   :  { %1759 = vst [vmem:[#allocation6 + $0x110] sm:$0xff] %v1695_v19  ;;  %v824_v43 = vadd.f32 %v823_v21, %v2834_v23 }
 0x29c   :  { %v992_v35 = vpop.f32.mrf.mxu3  ;;  %v1163_v25 = vpop.f32.mrf.mxu0 }
 0x29d   :  { %v993_v5 = vadd.f32 %v992_v35, %v2841_v36  ;;  %v1164_v28 = vadd.f32 %v1163_v25, %v2820_v11 }
 0x29e   :  { %v1332_v27 = vpop.f32.mrf.mxu1 }
 0x29f   :  { %v1567_v29 = vpack.c.bf16 %v993_v5, %v824_v43  ;;  %v1333_v31 = vadd.f32 %v1332_v27, %v2823_v12  ;;  %v2243_v43 = vld [vmem:[%s3283_s0 + $0xe0] sm:$0xff] }
 0x2a1   :  { %1631 = vst [vmem:[#allocation4 + $0x110] sm:$0xff] %v1567_v29  ;;  %v1696_v33 = vpack.c.bf16 %v1333_v31, %v1164_v28 }
 0x2a2   :  { %v825_v38 = vpop.f32.mrf.mxu2 }
 0x2a3   :  { %1760 = vst [vmem:[#allocation6 + $0x118] sm:$0xff] %v1696_v33  ;;  %v826_v40 = vadd.f32 %v825_v38, %v2834_v23 }
 0x2a4   :  { %v994_v41 = vpop.f32.mrf.mxu3  ;;  %v1166_v34 = vpop.f32.mrf.mxu0 }
 0x2a5   :  { %v995_v37 = vadd.f32 %v994_v41, %v2841_v36  ;;  %v1167_v42 = vadd.f32 %v1166_v34, %v2820_v11 }
 0x2a6   :  { %v1335_v44 = vpop.f32.mrf.mxu1 }
 0x2a7   :  { %v1568_v45 = vpack.c.bf16 %v995_v37, %v826_v40  ;;  %v1336_v24 = vadd.f32 %v1335_v44, %v2823_v12  ;;  %2084 = vmatmul.msk.bf16.gmra.mxu2 %vm294_vm0, %v2241_v49  ;;  %2148 = vmatmul.msk.bf16.gmra.mxu0 %vm294_vm0, %v2241_v49 }
 0x2a9   :  { %1632 = vst [vmem:[#allocation4 + $0x118] sm:$0xff] %v1568_v45  ;;  %v1697_v46 = vpack.c.bf16 %v1336_v24, %v1167_v42  ;;  %2116 = vmatmul.msk.bf16.gmra.mxu3 %vm294_vm0, %v2241_v49  ;;  %2180 = vmatmul.msk.bf16.gmra.mxu1 %vm294_vm0, %v2241_v49 }
 0x2aa   :  { %v828_v3 = vpop.f32.mrf.mxu2 }
 0x2ab   :  { %1761 = vst [vmem:[#allocation6 + $0x120] sm:$0xff] %v1697_v46  ;;  %v829_v47 = vadd.f32 %v828_v3, %v2834_v23 }
 0x2ac   :  { %v997_v48 = vpop.f32.mrf.mxu3  ;;  %v1168_v51 = vpop.f32.mrf.mxu0 }
 0x2ad   :  { %v998_v50 = vadd.f32 %v997_v48, %v2841_v36  ;;  %v1169_v52 = vadd.f32 %v1168_v51, %v2820_v11 }
 0x2ae   :  { %v1337_v53 = vpop.f32.mrf.mxu1 }
 0x2af   :  { %v1569_v54 = vpack.c.bf16 %v998_v50, %v829_v47  ;;  %v1338_v30 = vadd.f32 %v1337_v53, %v2823_v12  ;;  %v2244_v47 = vld [vmem:[%s3283_s0 + $0xe8] sm:$0xff] }
 0x2b1   :  { %1633 = vst [vmem:[#allocation4 + $0x120] sm:$0xff] %v1569_v54  ;;  %v1698_v20 = vpack.c.bf16 %v1338_v30, %v1169_v52 }
 0x2b2   :  { %v830_v55 = vpop.f32.mrf.mxu2 }
 0x2b3   :  { %1762 = vst [vmem:[#allocation6 + $0x128] sm:$0xff] %v1698_v20  ;;  %v831_v56 = vadd.f32 %v830_v55, %v2834_v23 }
 0x2b4   :  { %v999_v58 = vpop.f32.mrf.mxu3  ;;  %v1171_v60 = vpop.f32.mrf.mxu0 }
 0x2b5   :  { %v1000_v59 = vadd.f32 %v999_v58, %v2841_v36  ;;  %v1172_v57 = vadd.f32 %v1171_v60, %v2820_v11 }
 0x2b6   :  { %v1340_v61 = vpop.f32.mrf.mxu1 }
 0x2b7   :  { %v1570_v62 = vpack.c.bf16 %v1000_v59, %v831_v56  ;;  %v1341_v63 = vadd.f32 %v1340_v61, %v2823_v12  ;;  %2085 = vmatmul.msk.bf16.gmra.mxu2 %vm294_vm0, %v2242_v9  ;;  %2149 = vmatmul.msk.bf16.gmra.mxu0 %vm294_vm0, %v2242_v9 }
 0x2b9   :  { %1634 = vst [vmem:[#allocation4 + $0x128] sm:$0xff] %v1570_v62  ;;  %v1699_v39 = vpack.c.bf16 %v1341_v63, %v1172_v57  ;;  %2117 = vmatmul.msk.bf16.gmra.mxu3 %vm294_vm0, %v2242_v9  ;;  %2181 = vmatmul.msk.bf16.gmra.mxu1 %vm294_vm0, %v2242_v9 }
 0x2ba   :  { %v833_v0 = vpop.f32.mrf.mxu2 }
 0x2bb   :  { %1763 = vst [vmem:[#allocation6 + $0x130] sm:$0xff] %v1699_v39  ;;  %v834_v1 = vadd.f32 %v833_v0, %v2834_v23 }
 0x2bc   :  { %v1002_v26 = vpop.f32.mrf.mxu3  ;;  %v1173_v4 = vpop.f32.mrf.mxu0 }
 0x2bd   :  { %v1003_v2 = vadd.f32 %v1002_v26, %v2841_v36  ;;  %v1174_v6 = vadd.f32 %v1173_v4, %v2820_v11 }
 0x2be   :  { %v1342_v7 = vpop.f32.mrf.mxu1 }
 0x2bf   :  { %v1571_v8 = vpack.c.bf16 %v1003_v2, %v834_v1  ;;  %v1343_v10 = vadd.f32 %v1342_v7, %v2823_v12  ;;  %v2245_v1 = vld [vmem:[%s3283_s0 + $0xf0] sm:$0xff] }
 0x2c1   :  { %1635 = vst [vmem:[#allocation4 + $0x130] sm:$0xff] %v1571_v8  ;;  %v1700_v32 = vpack.c.bf16 %v1343_v10, %v1174_v6 }
 0x2c2   :  { %v835_v13 = vpop.f32.mrf.mxu2 }
 0x2c3   :  { %1764 = vst [vmem:[#allocation6 + $0x138] sm:$0xff] %v1700_v32  ;;  %v836_v22 = vadd.f32 %v835_v13, %v2834_v23 }
 0x2c4   :  { %v1004_v14 = vpop.f32.mrf.mxu3  ;;  %v1176_v17 = vpop.f32.mrf.mxu0 }
 0x2c5   :  { %v1005_v15 = vadd.f32 %v1004_v14, %v2841_v36  ;;  %v1177_v18 = vadd.f32 %v1176_v17, %v2820_v11 }
 0x2c6   :  { %v1345_v16 = vpop.f32.mrf.mxu1 }
 0x2c7   :  { %v1572_v19 = vpack.c.bf16 %v1005_v15, %v836_v22  ;;  %v1346_v21 = vadd.f32 %v1345_v16, %v2823_v12  ;;  %2086 = vmatmul.msk.bf16.gmra.mxu2 %vm294_vm0, %v2243_v43  ;;  %2150 = vmatmul.msk.bf16.gmra.mxu0 %vm294_vm0, %v2243_v43 }
 0x2c9   :  { %1636 = vst [vmem:[#allocation4 + $0x138] sm:$0xff] %v1572_v19  ;;  %v1701_v35 = vpack.c.bf16 %v1346_v21, %v1177_v18  ;;  %2118 = vmatmul.msk.bf16.gmra.mxu3 %vm294_vm0, %v2243_v43  ;;  %2182 = vmatmul.msk.bf16.gmra.mxu1 %vm294_vm0, %v2243_v43 }
 0x2ca   :  { %v838_v5 = vpop.f32.mrf.mxu2 }
 0x2cb   :  { %1765 = vst [vmem:[#allocation6 + $0x140] sm:$0xff] %v1701_v35  ;;  %v839_v25 = vadd.f32 %v838_v5, %v2834_v23 }
 0x2cc   :  { %v1007_v28 = vpop.f32.mrf.mxu3  ;;  %v1178_v29 = vpop.f32.mrf.mxu0 }
 0x2cd   :  { %v1008_v27 = vadd.f32 %v1007_v28, %v2841_v36  ;;  %v1179_v31 = vadd.f32 %v1178_v29, %v2820_v11 }
 0x2ce   :  { %v1347_v33 = vpop.f32.mrf.mxu1 }
 0x2cf   :  { %v1573_v38 = vpack.c.bf16 %v1008_v27, %v839_v25  ;;  %v1348_v40 = vadd.f32 %v1347_v33, %v2823_v12  ;;  %v2246_v25 = vld [vmem:[%s3283_s0 + $0xf8] sm:$0xff] }
 0x2d1   :  { %1637 = vst [vmem:[#allocation4 + $0x140] sm:$0xff] %v1573_v38  ;;  %v1702_v41 = vpack.c.bf16 %v1348_v40, %v1179_v31 }
 0x2d2   :  { %v840_v37 = vpop.f32.mrf.mxu2 }
 0x2d3   :  { %1766 = vst [vmem:[#allocation6 + $0x148] sm:$0xff] %v1702_v41  ;;  %v841_v34 = vadd.f32 %v840_v37, %v2834_v23 }
 0x2d4   :  { %v1009_v42 = vpop.f32.mrf.mxu3  ;;  %v1181_v45 = vpop.f32.mrf.mxu0 }
 0x2d5   :  { %v1010_v44 = vadd.f32 %v1009_v42, %v2841_v36  ;;  %v1182_v24 = vadd.f32 %v1181_v45, %v2820_v11 }
 0x2d6   :  { %v1350_v49 = vpop.f32.mrf.mxu1 }
 0x2d7   :  { %v1574_v46 = vpack.c.bf16 %v1010_v44, %v841_v34  ;;  %v1351_v3 = vadd.f32 %v1350_v49, %v2823_v12  ;;  %2087 = vmatmul.msk.bf16.gmra.mxu2 %vm294_vm0, %v2244_v47  ;;  %2151 = vmatmul.msk.bf16.gmra.mxu0 %vm294_vm0, %v2244_v47 }
 0x2d9   :  { %1638 = vst [vmem:[#allocation4 + $0x148] sm:$0xff] %v1574_v46  ;;  %v1703_v48 = vpack.c.bf16 %v1351_v3, %v1182_v24  ;;  %2119 = vmatmul.msk.bf16.gmra.mxu3 %vm294_vm0, %v2244_v47  ;;  %2183 = vmatmul.msk.bf16.gmra.mxu1 %vm294_vm0, %v2244_v47 }
 0x2da   :  { %v843_v50 = vpop.f32.mrf.mxu2 }
 0x2db   :  { %1767 = vst [vmem:[#allocation6 + $0x150] sm:$0xff] %v1703_v48  ;;  %v844_v51 = vadd.f32 %v843_v50, %v2834_v23 }
 0x2dc   :  { %v1012_v52 = vpop.f32.mrf.mxu3  ;;  %v1183_v54 = vpop.f32.mrf.mxu0 }
 0x2dd   :  { %v1013_v53 = vadd.f32 %v1012_v52, %v2841_v36  ;;  %v1184_v30 = vadd.f32 %v1183_v54, %v2820_v11 }
 0x2de   :  { %v1352_v20 = vpop.f32.mrf.mxu1 }
 0x2df   :  { %v1575_v55 = vpack.c.bf16 %v1013_v53, %v844_v51  ;;  %v1353_v56 = vadd.f32 %v1352_v20, %v2823_v12 }
 0x2e1   :  { %1639 = vst [vmem:[#allocation4 + $0x150] sm:$0xff] %v1575_v55  ;;  %v1704_v58 = vpack.c.bf16 %v1353_v56, %v1184_v30 }
 0x2e2   :  { %v845_v59 = vpop.f32.mrf.mxu2 }
 0x2e3   :  { %1768 = vst [vmem:[#allocation6 + $0x158] sm:$0xff] %v1704_v58  ;;  %v846_v60 = vadd.f32 %v845_v59, %v2834_v23 }
 0x2e4   :  { %v1014_v57 = vpop.f32.mrf.mxu3  ;;  %v1186_v62 = vpop.f32.mrf.mxu0 }
 0x2e5   :  { %v1015_v61 = vadd.f32 %v1014_v57, %v2841_v36  ;;  %v1187_v63 = vadd.f32 %v1186_v62, %v2820_v11 }
 0x2e6   :  { %v1355_v9 = vpop.f32.mrf.mxu1 }
 0x2e7   :  { %v1576_v39 = vpack.c.bf16 %v1015_v61, %v846_v60  ;;  %v1356_v0 = vadd.f32 %v1355_v9, %v2823_v12  ;;  %2088 = vmatmul.msk.bf16.gmra.mxu2 %vm294_vm0, %v2245_v1  ;;  %2152 = vmatmul.msk.bf16.gmra.mxu0 %vm294_vm0, %v2245_v1 }
 0x2e9   :  { %1640 = vst [vmem:[#allocation4 + $0x158] sm:$0xff] %v1576_v39  ;;  %v1705_v26 = vpack.c.bf16 %v1356_v0, %v1187_v63  ;;  %2120 = vmatmul.msk.bf16.gmra.mxu3 %vm294_vm0, %v2245_v1  ;;  %2184 = vmatmul.msk.bf16.gmra.mxu1 %vm294_vm0, %v2245_v1 }
 0x2ea   :  { %v848_v2 = vpop.f32.mrf.mxu2 }
 0x2eb   :  { %1769 = vst [vmem:[#allocation6 + $0x160] sm:$0xff] %v1705_v26  ;;  %v849_v4 = vadd.f32 %v848_v2, %v2834_v23 }
 0x2ec   :  { %v1017_v6 = vpop.f32.mrf.mxu3  ;;  %v1188_v8 = vpop.f32.mrf.mxu0 }
 0x2ed   :  { %v1018_v7 = vadd.f32 %v1017_v6, %v2841_v36  ;;  %v1189_v10 = vadd.f32 %v1188_v8, %v2820_v11 }
 0x2ee   :  { %v1357_v32 = vpop.f32.mrf.mxu1 }
 0x2ef   :  { %v1577_v13 = vpack.c.bf16 %v1018_v7, %v849_v4  ;;  %v1358_v22 = vadd.f32 %v1357_v32, %v2823_v12 }
 0x2f1   :  { %1641 = vst [vmem:[#allocation4 + $0x160] sm:$0xff] %v1577_v13  ;;  %v1706_v14 = vpack.c.bf16 %v1358_v22, %v1189_v10 }
 0x2f2   :  { %v850_v15 = vpop.f32.mrf.mxu2 }
 0x2f3   :  { %1770 = vst [vmem:[#allocation6 + $0x168] sm:$0xff] %v1706_v14  ;;  %v851_v17 = vadd.f32 %v850_v15, %v2834_v23 }
 0x2f4   :  { %v1019_v18 = vpop.f32.mrf.mxu3  ;;  %v1191_v19 = vpop.f32.mrf.mxu0 }
 0x2f5   :  { %v1020_v16 = vadd.f32 %v1019_v18, %v2841_v36  ;;  %v1192_v21 = vadd.f32 %v1191_v19, %v2820_v11 }
 0x2f6   :  { %v1360_v43 = vpop.f32.mrf.mxu1 }
 0x2f7   :  { %v1578_v35 = vpack.c.bf16 %v1020_v16, %v851_v17  ;;  %v1361_v5 = vadd.f32 %v1360_v43, %v2823_v12  ;;  %2089 = vmatmul.msk.bf16.gmra.mxu2 %vm294_vm0, %v2246_v25  ;;  %2153 = vmatmul.msk.bf16.gmra.mxu0 %vm294_vm0, %v2246_v25 }
 0x2f9   :  { %1642 = vst [vmem:[#allocation4 + $0x168] sm:$0xff] %v1578_v35  ;;  %v1707_v28 = vpack.c.bf16 %v1361_v5, %v1192_v21  ;;  %2121 = vmatmul.msk.bf16.gmra.mxu3 %vm294_vm0, %v2246_v25  ;;  %2185 = vmatmul.msk.bf16.gmra.mxu1 %vm294_vm0, %v2246_v25 }
 0x2fa   :  { %v853_v27 = vpop.f32.mrf.mxu2 }
 0x2fb   :  { %1771 = vst [vmem:[#allocation6 + $0x170] sm:$0xff] %v1707_v28  ;;  %v854_v29 = vadd.f32 %v853_v27, %v2834_v23 }
 0x2fc   :  { %v1022_v31 = vpop.f32.mrf.mxu3  ;;  %v1193_v38 = vpop.f32.mrf.mxu0 }
 0x2fd   :  { %v1023_v33 = vadd.f32 %v1022_v31, %v2841_v36  ;;  %v1194_v40 = vadd.f32 %v1193_v38, %v2820_v11 }
 0x2fe   :  { %v1362_v41 = vpop.f32.mrf.mxu1 }
 0x2ff   :  { %v1579_v37 = vpack.c.bf16 %v1023_v33, %v854_v29  ;;  %v1363_v34 = vadd.f32 %v1362_v41, %v2823_v12 }
 0x301   :  { %1643 = vst [vmem:[#allocation4 + $0x170] sm:$0xff] %v1579_v37  ;;  %v1708_v42 = vpack.c.bf16 %v1363_v34, %v1194_v40 }
 0x302   :  { %v855_v44 = vpop.f32.mrf.mxu2 }
 0x303   :  { %1772 = vst [vmem:[#allocation6 + $0x178] sm:$0xff] %v1708_v42  ;;  %v856_v45 = vadd.f32 %v855_v44, %v2834_v23 }
 0x304   :  { %v1024_v24 = vpop.f32.mrf.mxu3  ;;  %v1196_v46 = vpop.f32.mrf.mxu0 }
 0x305   :  { %v1025_v49 = vadd.f32 %v1024_v24, %v2841_v36  ;;  %v1197_v3 = vadd.f32 %v1196_v46, %v2820_v11 }
 0x306   :  { %v1365_v47 = vpop.f32.mrf.mxu1 }
 0x307   :  { %v1580_v48 = vpack.c.bf16 %v1025_v49, %v856_v45  ;;  %v1366_v50 = vadd.f32 %v1365_v47, %v2823_v12 }
 0x309   :  { %1644 = vst [vmem:[#allocation4 + $0x178] sm:$0xff] %v1580_v48  ;;  %v1709_v51 = vpack.c.bf16 %v1366_v50, %v1197_v3 }
 0x30a   :  { %v858_v52 = vpop.f32.mrf.mxu2 }
 0x30b   :  { %1773 = vst [vmem:[#allocation6 + $0x180] sm:$0xff] %v1709_v51  ;;  %v859_v53 = vadd.f32 %v858_v52, %v2834_v23 }
 0x30c   :  { %v1027_v54 = vpop.f32.mrf.mxu3  ;;  %v1198_v20 = vpop.f32.mrf.mxu0 }
 0x30d   :  { %v1028_v30 = vadd.f32 %v1027_v54, %v2841_v36  ;;  %v1199_v55 = vadd.f32 %v1198_v20, %v2820_v11 }
 0x30e   :  { %v1367_v56 = vpop.f32.mrf.mxu1 }
 0x30f   :  { %v1581_v58 = vpack.c.bf16 %v1028_v30, %v859_v53  ;;  %v1368_v59 = vadd.f32 %v1367_v56, %v2823_v12 }
 0x311   :  { %1645 = vst [vmem:[#allocation4 + $0x180] sm:$0xff] %v1581_v58  ;;  %v1710_v60 = vpack.c.bf16 %v1368_v59, %v1199_v55 }
 0x312   :  { %v860_v57 = vpop.f32.mrf.mxu2 }
 0x313   :  { %1774 = vst [vmem:[#allocation6 + $0x188] sm:$0xff] %v1710_v60  ;;  %v861_v61 = vadd.f32 %v860_v57, %v2834_v23 }
 0x314   :  { %v1029_v62 = vpop.f32.mrf.mxu3  ;;  %v1201_v9 = vpop.f32.mrf.mxu0 }
 0x315   :  { %v1030_v63 = vadd.f32 %v1029_v62, %v2841_v36  ;;  %v1202_v39 = vadd.f32 %v1201_v9, %v2820_v11 }
 0x316   :  { %v1370_v0 = vpop.f32.mrf.mxu1 }
 0x317   :  { %v1582_v1 = vpack.c.bf16 %v1030_v63, %v861_v61  ;;  %v1371_v26 = vadd.f32 %v1370_v0, %v2823_v12 }
 0x319   :  { %1646 = vst [vmem:[#allocation4 + $0x188] sm:$0xff] %v1582_v1  ;;  %v1711_v2 = vpack.c.bf16 %v1371_v26, %v1202_v39 }
 0x31a   :  { %v863_v4 = vpop.f32.mrf.mxu2 }
 0x31b   :  { %1775 = vst [vmem:[#allocation6 + $0x190] sm:$0xff] %v1711_v2  ;;  %v864_v6 = vadd.f32 %v863_v4, %v2834_v23 }
 0x31c   :  { %v1032_v7 = vpop.f32.mrf.mxu3  ;;  %v1203_v10 = vpop.f32.mrf.mxu0 }
 0x31d   :  { %v1033_v8 = vadd.f32 %v1032_v7, %v2841_v36  ;;  %v1204_v32 = vadd.f32 %v1203_v10, %v2820_v11 }
 0x31e   :  { %v1372_v13 = vpop.f32.mrf.mxu1 }
 0x31f   :  { %v1583_v22 = vpack.c.bf16 %v1033_v8, %v864_v6  ;;  %v1373_v14 = vadd.f32 %v1372_v13, %v2823_v12 }
 0x321   :  { %1647 = vst [vmem:[#allocation4 + $0x190] sm:$0xff] %v1583_v22  ;;  %v1712_v15 = vpack.c.bf16 %v1373_v14, %v1204_v32 }
 0x322   :  { %v865_v17 = vpop.f32.mrf.mxu2 }
 0x323   :  { %1776 = vst [vmem:[#allocation6 + $0x198] sm:$0xff] %v1712_v15  ;;  %v866_v18 = vadd.f32 %v865_v17, %v2834_v23 }
 0x324   :  { %v1034_v16 = vpop.f32.mrf.mxu3  ;;  %v1206_v21 = vpop.f32.mrf.mxu0 }
 0x325   :  { %v1035_v19 = vadd.f32 %v1034_v16, %v2841_v36  ;;  %v1207_v43 = vadd.f32 %v1206_v21, %v2820_v11 }
 0x326   :  { %v1375_v35 = vpop.f32.mrf.mxu1 }
 0x327   :  { %v1584_v5 = vpack.c.bf16 %v1035_v19, %v866_v18  ;;  %v1376_v25 = vadd.f32 %v1375_v35, %v2823_v12 }
 0x329   :  { %1648 = vst [vmem:[#allocation4 + $0x198] sm:$0xff] %v1584_v5  ;;  %v1713_v28 = vpack.c.bf16 %v1376_v25, %v1207_v43 }
 0x32a   :  { %v868_v27 = vpop.f32.mrf.mxu2 }
 0x32b   :  { %1777 = vst [vmem:[#allocation6 + $0x1a0] sm:$0xff] %v1713_v28  ;;  %v869_v29 = vadd.f32 %v868_v27, %v2834_v23 }
 0x32c   :  { %v1037_v31 = vpop.f32.mrf.mxu3  ;;  %v1208_v38 = vpop.f32.mrf.mxu0 }
 0x32d   :  { %v1038_v33 = vadd.f32 %v1037_v31, %v2841_v36  ;;  %v1209_v40 = vadd.f32 %v1208_v38, %v2820_v11 }
 0x32e   :  { %v1377_v41 = vpop.f32.mrf.mxu1 }
 0x32f   :  { %v1585_v37 = vpack.c.bf16 %v1038_v33, %v869_v29  ;;  %v1378_v34 = vadd.f32 %v1377_v41, %v2823_v12 }
 0x331   :  { %1649 = vst [vmem:[#allocation4 + $0x1a0] sm:$0xff] %v1585_v37  ;;  %v1714_v42 = vpack.c.bf16 %v1378_v34, %v1209_v40 }
 0x332   :  { %v870_v44 = vpop.f32.mrf.mxu2 }
 0x333   :  { %1778 = vst [vmem:[#allocation6 + $0x1a8] sm:$0xff] %v1714_v42  ;;  %v871_v45 = vadd.f32 %v870_v44, %v2834_v23 }
 0x334   :  { %v1039_v24 = vpop.f32.mrf.mxu3  ;;  %v1211_v46 = vpop.f32.mrf.mxu0 }
 0x335   :  { %v1040_v49 = vadd.f32 %v1039_v24, %v2841_v36  ;;  %v1212_v3 = vadd.f32 %v1211_v46, %v2820_v11 }
 0x336   :  { %v1380_v47 = vpop.f32.mrf.mxu1 }
 0x337   :  { %v1586_v48 = vpack.c.bf16 %v1040_v49, %v871_v45  ;;  %v1381_v50 = vadd.f32 %v1380_v47, %v2823_v12 }
 0x339   :  { %1650 = vst [vmem:[#allocation4 + $0x1a8] sm:$0xff] %v1586_v48  ;;  %v1715_v51 = vpack.c.bf16 %v1381_v50, %v1212_v3 }
 0x33a   :  { %v873_v52 = vpop.f32.mrf.mxu2 }
 0x33b   :  { %1779 = vst [vmem:[#allocation6 + $0x1b0] sm:$0xff] %v1715_v51  ;;  %v874_v53 = vadd.f32 %v873_v52, %v2834_v23 }
 0x33c   :  { %v1042_v54 = vpop.f32.mrf.mxu3  ;;  %v1213_v20 = vpop.f32.mrf.mxu0 }
 0x33d   :  { %v1043_v30 = vadd.f32 %v1042_v54, %v2841_v36  ;;  %v1214_v55 = vadd.f32 %v1213_v20, %v2820_v11 }
 0x33e   :  { %v1382_v56 = vpop.f32.mrf.mxu1 }
 0x33f   :  { %v1587_v58 = vpack.c.bf16 %v1043_v30, %v874_v53  ;;  %v1383_v59 = vadd.f32 %v1382_v56, %v2823_v12 }
 0x341   :  { %1651 = vst [vmem:[#allocation4 + $0x1b0] sm:$0xff] %v1587_v58  ;;  %v1716_v60 = vpack.c.bf16 %v1383_v59, %v1214_v55 }
 0x342   :  { %v875_v57 = vpop.f32.mrf.mxu2 }
 0x343   :  { %1780 = vst [vmem:[#allocation6 + $0x1b8] sm:$0xff] %v1716_v60  ;;  %v876_v61 = vadd.f32 %v875_v57, %v2834_v23 }
 0x344   :  { %v1044_v62 = vpop.f32.mrf.mxu3  ;;  %v1216_v9 = vpop.f32.mrf.mxu0 }
 0x345   :  { %v1045_v63 = vadd.f32 %v1044_v62, %v2841_v36  ;;  %v1217_v39 = vadd.f32 %v1216_v9, %v2820_v11 }
 0x346   :  { %v1385_v0 = vpop.f32.mrf.mxu1 }
 0x347   :  { %v1588_v1 = vpack.c.bf16 %v1045_v63, %v876_v61  ;;  %v1386_v26 = vadd.f32 %v1385_v0, %v2823_v12 }
 0x349   :  { %1652 = vst [vmem:[#allocation4 + $0x1b8] sm:$0xff] %v1588_v1  ;;  %v1717_v2 = vpack.c.bf16 %v1386_v26, %v1217_v39 }
 0x34a   :  { %v878_v4 = vpop.f32.mrf.mxu2 }
 0x34b   :  { %1781 = vst [vmem:[#allocation6 + $0x1c0] sm:$0xff] %v1717_v2  ;;  %v879_v6 = vadd.f32 %v878_v4, %v2834_v23 }
 0x34c   :  { %v1047_v7 = vpop.f32.mrf.mxu3  ;;  %v1218_v10 = vpop.f32.mrf.mxu0 }
 0x34d   :  { %v1048_v8 = vadd.f32 %v1047_v7, %v2841_v36  ;;  %v1219_v32 = vadd.f32 %v1218_v10, %v2820_v11 }
 0x34e   :  { %v1387_v13 = vpop.f32.mrf.mxu1 }
 0x34f   :  { %v1589_v22 = vpack.c.bf16 %v1048_v8, %v879_v6  ;;  %v1388_v14 = vadd.f32 %v1387_v13, %v2823_v12 }
 0x351   :  { %1653 = vst [vmem:[#allocation4 + $0x1c0] sm:$0xff] %v1589_v22  ;;  %v1718_v15 = vpack.c.bf16 %v1388_v14, %v1219_v32 }
 0x352   :  { %v880_v17 = vpop.f32.mrf.mxu2 }
 0x353   :  { %1782 = vst [vmem:[#allocation6 + $0x1c8] sm:$0xff] %v1718_v15  ;;  %v881_v18 = vadd.f32 %v880_v17, %v2834_v23 }
 0x354   :  { %v1049_v16 = vpop.f32.mrf.mxu3  ;;  %v1221_v21 = vpop.f32.mrf.mxu0 }
 0x355   :  { %v1050_v19 = vadd.f32 %v1049_v16, %v2841_v36  ;;  %v1222_v43 = vadd.f32 %v1221_v21, %v2820_v11 }
 0x356   :  { %v1390_v35 = vpop.f32.mrf.mxu1 }
 0x357   :  { %v1590_v5 = vpack.c.bf16 %v1050_v19, %v881_v18  ;;  %v1391_v25 = vadd.f32 %v1390_v35, %v2823_v12 }
 0x359   :  { %1654 = vst [vmem:[#allocation4 + $0x1c8] sm:$0xff] %v1590_v5  ;;  %v1719_v28 = vpack.c.bf16 %v1391_v25, %v1222_v43 }
 0x35a   :  { %v883_v27 = vpop.f32.mrf.mxu2 }
 0x35b   :  { %1783 = vst [vmem:[#allocation6 + $0x1d0] sm:$0xff] %v1719_v28  ;;  %v884_v29 = vadd.f32 %v883_v27, %v2834_v23 }
 0x35c   :  { %v1052_v31 = vpop.f32.mrf.mxu3  ;;  %v1223_v38 = vpop.f32.mrf.mxu0 }
 0x35d   :  { %v1053_v33 = vadd.f32 %v1052_v31, %v2841_v36  ;;  %v1224_v40 = vadd.f32 %v1223_v38, %v2820_v11 }
 0x35e   :  { %v1392_v41 = vpop.f32.mrf.mxu1 }
 0x35f   :  { %v1591_v37 = vpack.c.bf16 %v1053_v33, %v884_v29  ;;  %v1393_v34 = vadd.f32 %v1392_v41, %v2823_v12 }
 0x361   :  { %1655 = vst [vmem:[#allocation4 + $0x1d0] sm:$0xff] %v1591_v37  ;;  %v1720_v42 = vpack.c.bf16 %v1393_v34, %v1224_v40 }
 0x362   :  { %v885_v44 = vpop.f32.mrf.mxu2 }
 0x363   :  { %1784 = vst [vmem:[#allocation6 + $0x1d8] sm:$0xff] %v1720_v42  ;;  %v886_v45 = vadd.f32 %v885_v44, %v2834_v23 }
 0x364   :  { %v1054_v24 = vpop.f32.mrf.mxu3  ;;  %v1226_v46 = vpop.f32.mrf.mxu0 }
 0x365   :  { %v1055_v49 = vadd.f32 %v1054_v24, %v2841_v36  ;;  %v1227_v3 = vadd.f32 %v1226_v46, %v2820_v11 }
 0x366   :  { %v1395_v47 = vpop.f32.mrf.mxu1 }
 0x367   :  { %v1592_v48 = vpack.c.bf16 %v1055_v49, %v886_v45  ;;  %v1396_v50 = vadd.f32 %v1395_v47, %v2823_v12 }
 0x369   :  { %1656 = vst [vmem:[#allocation4 + $0x1d8] sm:$0xff] %v1592_v48  ;;  %v1721_v51 = vpack.c.bf16 %v1396_v50, %v1227_v3 }
 0x36a   :  { %v888_v52 = vpop.f32.mrf.mxu2 }
 0x36b   :  { %1785 = vst [vmem:[#allocation6 + $0x1e0] sm:$0xff] %v1721_v51  ;;  %v889_v53 = vadd.f32 %v888_v52, %v2834_v23 }
 0x36c   :  { %v1057_v54 = vpop.f32.mrf.mxu3  ;;  %v1228_v20 = vpop.f32.mrf.mxu0 }
 0x36d   :  { %v1058_v30 = vadd.f32 %v1057_v54, %v2841_v36  ;;  %v1229_v55 = vadd.f32 %v1228_v20, %v2820_v11 }
 0x36e   :  { %v1397_v56 = vpop.f32.mrf.mxu1 }
 0x36f   :  { %v1593_v58 = vpack.c.bf16 %v1058_v30, %v889_v53  ;;  %v1398_v59 = vadd.f32 %v1397_v56, %v2823_v12 }
 0x371   :  { %1657 = vst [vmem:[#allocation4 + $0x1e0] sm:$0xff] %v1593_v58  ;;  %v1722_v60 = vpack.c.bf16 %v1398_v59, %v1229_v55 }
 0x372   :  { %v890_v57 = vpop.f32.mrf.mxu2 }
 0x373   :  { %1786 = vst [vmem:[#allocation6 + $0x1e8] sm:$0xff] %v1722_v60  ;;  %v891_v61 = vadd.f32 %v890_v57, %v2834_v23 }
 0x374   :  { %v1059_v62 = vpop.f32.mrf.mxu3  ;;  %v1231_v9 = vpop.f32.mrf.mxu0 }
 0x375   :  { %v1060_v63 = vadd.f32 %v1059_v62, %v2841_v36  ;;  %v1232_v39 = vadd.f32 %v1231_v9, %v2820_v11 }
 0x376   :  { %v1400_v0 = vpop.f32.mrf.mxu1 }
 0x377   :  { %v1594_v1 = vpack.c.bf16 %v1060_v63, %v891_v61  ;;  %v1401_v26 = vadd.f32 %v1400_v0, %v2823_v12 }
 0x379   :  { %1658 = vst [vmem:[#allocation4 + $0x1e8] sm:$0xff] %v1594_v1  ;;  %v1723_v2 = vpack.c.bf16 %v1401_v26, %v1232_v39 }
 0x37a   :  { %v893_v4 = vpop.f32.mrf.mxu2 }
 0x37b   :  { %1787 = vst [vmem:[#allocation6 + $0x1f0] sm:$0xff] %v1723_v2  ;;  %v894_v6 = vadd.f32 %v893_v4, %v2834_v23 }
 0x37c   :  { %v1062_v7 = vpop.f32.mrf.mxu3  ;;  %v1233_v10 = vpop.f32.mrf.mxu0 }
 0x37d   :  { %v1063_v8 = vadd.f32 %v1062_v7, %v2841_v36  ;;  %v1234_v32 = vadd.f32 %v1233_v10, %v2820_v11 }
 0x37e   :  { %v1402_v13 = vpop.f32.mrf.mxu1 }
 0x37f   :  { %v1595_v22 = vpack.c.bf16 %v1063_v8, %v894_v6  ;;  %v1403_v14 = vadd.f32 %v1402_v13, %v2823_v12 }
 0x381   :  { %1659 = vst [vmem:[#allocation4 + $0x1f0] sm:$0xff] %v1595_v22  ;;  %v1724_v15 = vpack.c.bf16 %v1403_v14, %v1234_v32 }
 0x382   :  { %v895_v17 = vpop.f32.mrf.mxu2 }
 0x383   :  { %1788 = vst [vmem:[#allocation6 + $0x1f8] sm:$0xff] %v1724_v15  ;;  %v896_v18 = vadd.f32 %v895_v17, %v2834_v23 }
 0x384   :  { %v1064_v16 = vpop.f32.mrf.mxu3 }
 0x385   :  { %v1065_v19 = vadd.f32 %v1064_v16, %v2841_v36 }
 0x387   :  { %v1596_v11 = vpack.c.bf16 %v1065_v19, %v896_v18 }
 0x389   :  { %1660 = vst [vmem:[#allocation4 + $0x1f8] sm:$0xff] %v1596_v11 }
 0x38a   :  { %1814 = dma.vmem_to_hbm [thread:$0]  %s1807_s14, 8192, %s1809_s17, [#allocation5], %s2324_s12, %s2324_s12, %s2325_s13  }
 0x38b   :  { %1827 = dma.vmem_to_hbm [thread:$0]  %s1820_s19, 8192, %s1822_s22, [#allocation5], %s2324_s12, %s2324_s12, %s2325_s13  }
 0x38c   :  { %2319 = dma.done.wait [#allocation3], 8192  }
 0x38d   :  { %2320 = vsyncadd [#allocation3], 4294959104 }
 0x38e   :  { %2321 = dma.done.wait [#allocation5], 16384  }
 0x38f   :  { %2322 = vsyncadd [#allocation5], 4294950912 }
 0x390   :  { %1840 = vsyncpa [#allocation3], 1 }
 0x391   :  { %1841 = vsyncpa [#allocation5], 1 }

</bundles_post_ra>
